<compile_context>
chip_gen: v5e
topology: v5e:2x2
jax: 0.10.0
libtpu: 0.0.40
codegen_flags: <defaults>
</compile_context>

<pallas_src>
import functools

import numpy as np
import jax
import jax.numpy as jnp
from jax import lax
from jax.experimental import pallas as pl
from jax.experimental.pallas import tpu as pltpu


OUT_SP = 7  # AdaptiveAvgPool3d target (7, 7, 7)


# ----------------------------------------------------------------------------
# Kernel 1: fused Conv3d('same') + ReLU + AdaptiveAvgPool3d((7,7,7))
# ----------------------------------------------------------------------------
def _conv_relu_pool_kernel(x_ref, w_ref, b_ref, pr_ref, pc_ref, o_ref, acc_ref,
                           *, kD, Hp, D, nb):
    rows = D * Hp
    for b in range(nb):                              # static unroll (nb small)
        # kd taps only: kh is stacked on the lane axis of x, kw is folded into
        # the block-diagonal weight.  Row offsets kd*Hp are sublane-aligned.
        for kd in range(kD):
            slab = x_ref[b, kd * Hp:kd * Hp + rows, :]      # (rows, kH*Wp*Cin) bf16
            contrib = jnp.dot(slab, w_ref[kd],
                              preferred_element_type=jnp.float32)
            if kd == 0:
                acc_ref[...] = contrib
            else:
                acc_ref[...] += contrib

        # bias + ReLU epilogue in f32; rows with h >= H are junk (pooled away)
        a = jnp.maximum(acc_ref[...] + b_ref[...], 0.0).astype(jnp.bfloat16)

        # AdaptiveAvgPool3d as two small bf16 matmuls (exact 1/4 and 1/2
        # coefficients):  rows (d,h)->(od,oh) via pr,  lanes (w,c)->(ow,c) via pc
        pooled = jnp.dot(pr_ref[...], a, preferred_element_type=jnp.float32)
        pooled = jnp.dot(pooled.astype(jnp.bfloat16), pc_ref[...],
                         preferred_element_type=jnp.float32)
        o_ref[b] = pooled.astype(o_ref.dtype)        # (49, 7*Cout) bf16


def conv3d_relu_avgpool(x, wblk, b_exp, pr, pc):
    """features(Conv3d 'same' + ReLU) -> AdaptiveAvgPool3d((7,)*3) -> flatten.

    Returns (N, 7*7*7*Cout) bf16 in (od, oh, ow, co) row-major order (the
    channel-major torch.flatten permutation is folded into fc1's weight rows).
    """
    N, Cin, D, H, W = x.shape
    kD = wblk.shape[0]                 # cubic kernel, 'same' padding assumed
    kH = kW = kD
    pad = (kD - 1) // 2
    Dp, Hp, Wp = D + 2 * pad, H + 2 * pad, W + 2 * pad
    Cout = wblk.shape[2] // W
    assert wblk.shape[1] == kH * Wp * Cin
    # TODO(synk): adaptive pooling implemented only for D, H, W exact multiples
    # of 7 (even windows); true uneven adaptive windows are not implemented.
    assert D % OUT_SP == 0 and H % OUT_SP == 0 and W % OUT_SP == 0

    # batch packing: amortize grid-step overhead, but keep >=2 grid steps so
    # both v7x TensorCores get work.
    if N >= 8:
        nb = 4
    elif N >= 4:
        nb = 2
    else:
        nb = 1
    n_pad = ((N + nb - 1) // nb) * nb

    # --- per-call activation glue (~3x the tiny input bytes):
    #     channels-last, 'same' spatial padding, rows=(d',h'), lanes=(kh,w',ci)
    #     with the kH row-shifted copies stacked along the lane axis. ---
    x_cl = jnp.pad(jnp.transpose(x, (0, 2, 3, 4, 1)),
                   ((0, n_pad - N), (pad, pad), (pad, pad), (pad, pad), (0, 0)))
    x2d = x_cl.reshape(n_pad, Dp * Hp, Wp * Cin).astype(jnp.bfloat16)
    x2d = jnp.pad(x2d, ((0, 0), (0, kH - 1), (0, 0)))          # headroom for kh shifts
    x_s = jnp.concatenate([x2d[:, kh:kh + Dp * Hp, :] for kh in range(kH)],
                          axis=-1)                             # (n_pad, Dp*Hp, kH*Wp*Cin)

    n_pool = OUT_SP * OUT_SP
    kern = functools.partial(_conv_relu_pool_kernel, kD=kD, Hp=Hp, D=D, nb=nb)
    pooled = pl.pallas_call(
        kern,
        out_shape=jax.ShapeDtypeStruct((n_pad, n_pool, OUT_SP * Cout),
                                       jnp.bfloat16),
        grid=(n_pad // nb,),
        in_specs=[
            pl.BlockSpec((nb, Dp * Hp, kH * Wp * Cin), lambda n: (n, 0, 0)),
            pl.BlockSpec((kD, kH * Wp * Cin, W * Cout), lambda n: (0, 0, 0)),
            pl.BlockSpec((1, W * Cout), lambda n: (0, 0)),
            pl.BlockSpec((n_pool, D * Hp), lambda n: (0, 0)),
            pl.BlockSpec((W * Cout, OUT_SP * Cout), lambda n: (0, 0)),
        ],
        out_specs=pl.BlockSpec((nb, n_pool, OUT_SP * Cout), lambda n: (n, 0, 0)),
        scratch_shapes=[pltpu.VMEM((D * Hp, W * Cout), jnp.float32)],
        compiler_params=pltpu.CompilerParams(
            dimension_semantics=("parallel",)),     # batch shards across TCs
    )(x_s, wblk, b_exp, pr, pc)

    # row-major flatten; matches the permuted fc1 weight rows (no transpose).
    return pooled[:N].reshape(N, n_pool * OUT_SP * Cout)


# ----------------------------------------------------------------------------
# Kernel 2: fused classifier  fc1 + ReLU (+Dropout) + fc2 + ReLU (+Dropout) + fc3
# ----------------------------------------------------------------------------
def _classifier_kernel(x_ref, w1_ref, b1_ref, w2_ref, b2_ref, w3_ref, b3_ref,
                       o_ref, h1_acc):
    k = pl.program_id(1)

    @pl.when(k == 0)
    def _init():
        h1_acc[...] = jnp.zeros_like(h1_acc)

    h1_acc[...] += jnp.dot(x_ref[...], w1_ref[...],
                           preferred_element_type=jnp.float32)

    @pl.when(k == pl.num_programs(1) - 1)
    def _epilogue():
        h1 = jnp.maximum(h1_acc[...] + b1_ref[...], 0.0)
        # TODO(synk): Dropout(0.5) treated as identity (inference semantics).
        h2 = jnp.dot(h1.astype(w2_ref.dtype), w2_ref[...],
                     preferred_element_type=jnp.float32) + b2_ref[...]
        h2 = jnp.maximum(h2, 0.0)
        out = jnp.dot(h2.astype(w3_ref.dtype), w3_ref[...],
                      preferred_element_type=jnp.float32) + b3_ref[...]
        o_ref[...] = out.astype(o_ref.dtype)


def fused_classifier(x, w1p, b1, w2, b2, w3p, b3p, num_classes):
    """logits = relu(relu(x@w1+b1)@w2+b2)@w3+b3 in a single pallas_call."""
    N, K = x.shape
    k_pad, H1 = w1p.shape
    H2 = w2.shape[1]
    c_pad = w3p.shape[1]
    assert K <= k_pad and H1 % 128 == 0 and H2 % 128 == 0 and c_pad % 128 == 0

    # batch (row) tiling: multiple of 8; parallel grid axis for large batches.
    if N <= 128:
        n_pad = max(8, ((N + 7) // 8) * 8)
        tb = n_pad
    else:
        n_pad = ((N + 127) // 128) * 128
        tb = 128
    # K-tile fc1 only when its weight block would get large (v7x 64 MiB VMEM).
    tk = k_pad if k_pad <= 4096 else 2048
    assert k_pad % tk == 0
    nk = k_pad // tk

    xb = jnp.pad(x.astype(jnp.bfloat16), ((0, n_pad - N), (0, k_pad - K)))

    w1_spec = pl.BlockSpec((tk, H1), lambda m, k: (k, 0))
    if nk > 1:
        # deeper buffering on the w1 stream when fc1 is K-tiled (DMA-bound path)
        w1_spec = pl.BlockSpec((tk, H1), lambda m, k: (k, 0),
                               pipeline_mode=pl.Buffered(3))

    out = pl.pallas_call(
        _classifier_kernel,
        out_shape=jax.ShapeDtypeStruct((n_pad, c_pad), jnp.float32),
        grid=(n_pad // tb, nk),
        in_specs=[
            pl.BlockSpec((tb, tk), lambda m, k: (m, k)),
            w1_spec,
            pl.BlockSpec((1, H1), lambda m, k: (0, 0)),
            pl.BlockSpec((H1, H2), lambda m, k: (0, 0)),
            pl.BlockSpec((1, H2), lambda m, k: (0, 0)),
            pl.BlockSpec((H2, c_pad), lambda m, k: (0, 0)),
            pl.BlockSpec((1, c_pad), lambda m, k: (0, 0)),
        ],
        out_specs=pl.BlockSpec((tb, c_pad), lambda m, k: (m, 0)),
        scratch_shapes=[pltpu.VMEM((tb, H1), jnp.float32)],
        compiler_params=pltpu.CompilerParams(
            dimension_semantics=("parallel", "arbitrary")),
    )(xb, w1p, b1, w2, b2, w3p, b3p)
    return out[:N, :num_classes]


# ----------------------------------------------------------------------------
# One-time, batch-independent weight repacking (hoisted out of the jitted path)
# ----------------------------------------------------------------------------
def pack_params(params, input_shape):
    _, Cin, D, H, W = input_shape
    conv_w = np.asarray(params["conv_w"], np.float32)   # (Cout, Cin, kD, kH, kW)
    conv_b = np.asarray(params["conv_b"], np.float32)
    Cout, _, kD, kH, kW = conv_w.shape
    pad = (kD - 1) // 2
    Hp, Wp = H + 2 * pad, W + 2 * pad
    pd, ph, pw = D // OUT_SP, H // OUT_SP, W // OUT_SP

    # conv as kD block-diagonal taps: rows index (kh, w+kw, ci), cols index (w, co)
    wblk = np.zeros((kD, kH * Wp * Cin, W * Cout), np.float32)
    for kd in range(kD):
        for kh in range(kH):
            for kw in range(kW):
                for w in range(W):
                    r0 = kh * Wp * Cin + (w + kw) * Cin
                    wblk[kd, r0:r0 + Cin, w * Cout:(w + 1) * Cout] = \
                        conv_w[:, :, kd, kh, kw].T
    b_exp = np.tile(conv_b, W).reshape(1, W * Cout)

    # adaptive-average-pool matrices (coefficients exact in bf16 here)
    pr = np.zeros((OUT_SP * OUT_SP, D * Hp), np.float32)
    for d in range(D):
        for h in range(H):
            pr[(d // pd) * OUT_SP + (h // ph), d * Hp + h] = 1.0 / (pd * ph)
    pc = np.zeros((W * Cout, OUT_SP * Cout), np.float32)
    for w in range(W):
        for c in range(Cout):
            pc[w * Cout + c, (w // pw) * Cout + c] = 1.0 / pw

    # classifier: fold torch.flatten's channel-major order into w1's rows and
    # pad K up to a multiple of 256 (MXU K-pass granularity on v6e/v7x).
    w1 = np.asarray(params["fc1_w"], np.float32)        # (Cout*343, 512)
    H1 = w1.shape[1]
    K = Cout * OUT_SP ** 3
    assert w1.shape[0] == K
    perm = np.empty((K,), np.int64)
    q = 0
    for od in range(OUT_SP):
        for oh in range(OUT_SP):
            for ow in range(OUT_SP):
                for co in range(Cout):
                    perm[q] = ((co * OUT_SP + od) * OUT_SP + oh) * OUT_SP + ow
                    q += 1
    k_pad = ((K + 255) // 256) * 256
    w1p = np.pad(w1[perm, :], ((0, k_pad - K), (0, 0)))

    w2 = np.asarray(params["fc2_w"], np.float32)
    w3 = np.asarray(params["fc3_w"], np.float32)
    H2, C = w3.shape
    c_pad = ((C + 127) // 128) * 128
    w3p = np.pad(w3, ((0, 0), (0, c_pad - C)))
    b3p = np.pad(np.asarray(params["fc3_b"], np.float32), (0, c_pad - C))

    return {
        "wblk": jnp.asarray(wblk, jnp.bfloat16),
        "conv_b": jnp.asarray(b_exp, jnp.float32),
        "pr": jnp.asarray(pr, jnp.bfloat16),
        "pc": jnp.asarray(pc, jnp.bfloat16),
        "w1": jnp.asarray(w1p, jnp.bfloat16),
        "b1": jnp.asarray(params["fc1_b"], jnp.float32).reshape(1, H1),
        "w2": jnp.asarray(w2, jnp.bfloat16),
        "b2": jnp.asarray(params["fc2_b"], jnp.float32).reshape(1, H2),
        "w3": jnp.asarray(w3p, jnp.bfloat16),
        "b3": jnp.asarray(b3p, jnp.float32).reshape(1, c_pad),
    }


# ----------------------------------------------------------------------------
# Full forward
# ----------------------------------------------------------------------------
@functools.partial(jax.jit, static_argnames=("num_classes",))
def vgg_forward(x, packed, *, num_classes):
    flat = conv3d_relu_avgpool(x, packed["wblk"], packed["conv_b"],
                               packed["pr"], packed["pc"])
    return fused_classifier(flat, packed["w1"], packed["b1"],
                            packed["w2"], packed["b2"],
                            packed["w3"], packed["b3"], num_classes)


# ----------------------------------------------------------------------------
# Pure-JAX references with matching bf16-operand / f32-accumulate precision
# ----------------------------------------------------------------------------
def ref_features(x, p):
    out = lax.conv_general_dilated(
        x.astype(jnp.bfloat16), p["conv_w"].astype(jnp.bfloat16),
        window_strides=(1, 1, 1), padding=((1, 1), (1, 1), (1, 1)),
        dimension_numbers=("NCDHW", "OIDHW", "NCDHW"),
        preferred_element_type=jnp.float32)
    out = jnp.maximum(
        out + p["conv_b"].astype(jnp.float32)[None, :, None, None, None], 0.0)
    N, C, D, H, W = out.shape
    out = out.reshape(N, C, OUT_SP, D // OUT_SP, OUT_SP, H // OUT_SP,
                      OUT_SP, W // OUT_SP).mean(axis=(3, 5, 7))
    return out.reshape(N, -1)          # channel-major torch.flatten order


def ref_forward(x, p):
    flat = ref_features(x, p)

    def dense(v, w, b, relu):
        y = jnp.dot(v.astype(jnp.bfloat16), w.astype(jnp.bfloat16),
                    preferred_element_type=jnp.float32) + b.astype(jnp.float32)
        return jnp.maximum(y, 0.0) if relu else y

    h = dense(flat, p["fc1_w"], p["fc1_b"], True)
    h = dense(h, p["fc2_w"], p["fc2_b"], True)
    return dense(h, p["fc3_w"], p["fc3_b"], False)


# ----------------------------------------------------------------------------
# Deterministic parameter init (mirrors _initialize_weights)
# ----------------------------------------------------------------------------
def init_params(key, c_in=4, c_out=8, num_classes=3):
    ks = jax.random.split(key, 4)
    fan_out = c_out * 3 * 3 * 3
    std_conv = (2.0 / fan_out) ** 0.5        # kaiming_normal_(mode='fan_out', relu)
    return {
        "conv_w": std_conv * jax.random.normal(ks[0], (c_out, c_in, 3, 3, 3),
                                               jnp.float32),
        "conv_b": jnp.zeros((c_out,), jnp.float32),
        # Linear weights stored (in, out); PyTorch stores (out, in) — same init
        # distribution.  Real checkpoint loading must transpose.
        "fc1_w": 0.01 * jax.random.normal(ks[1], (c_out * OUT_SP ** 3, 512),
                                          jnp.float32),
        "fc1_b": jnp.zeros((512,), jnp.float32),
        "fc2_w": 0.01 * jax.random.normal(ks[2], (512, 256), jnp.float32),
        "fc2_b": jnp.zeros((256,), jnp.float32),
        "fc3_w": 0.01 * jax.random.normal(ks[3], (256, num_classes), jnp.float32),
        "fc3_b": jnp.zeros((num_classes,), jnp.float32),
    }


if __name__ == "__main__":
    key = jax.random.PRNGKey(0)
    k_x, k_p = jax.random.split(key)

    # NCDHW input: batch=2, channels=4, depth=height=width=14 (multiple of 7)
    N, C_IN, C_OUT, NUM_CLASSES = 2, 4, 8, 3
    x = jax.random.normal(k_x, (N, C_IN, 14, 14, 14), jnp.float32)
    params = init_params(k_p, c_in=C_IN, c_out=C_OUT, num_classes=NUM_CLASSES)
    packed = pack_params(params, x.shape)       # one-time weight repack

    # Check the fused conv+relu+pool kernel against the reference (reorder the
    # kernel's (od,oh,ow,co) flatten to channel-major for comparison only).
    flat = jax.block_until_ready(jax.jit(conv3d_relu_avgpool)(
        x, packed["wblk"], packed["conv_b"], packed["pr"], packed["pc"]))
    flat_cm = flat.astype(jnp.float32).reshape(N, OUT_SP, OUT_SP, OUT_SP, C_OUT)
    flat_cm = flat_cm.transpose(0, 4, 1, 2, 3).reshape(N, -1)
    flat_ref = jax.block_until_ready(ref_features(x, params))
    assert flat_cm.shape == flat_ref.shape == (N, C_OUT * OUT_SP ** 3), flat.shape
    assert jnp.allclose(flat_cm, flat_ref, rtol=2e-2, atol=2e-3), (
        "features mismatch", float(jnp.max(jnp.abs(flat_cm - flat_ref))))

    # End-to-end forward.
    logits = jax.block_until_ready(vgg_forward(x, packed, num_classes=NUM_CLASSES))
    assert logits.shape == (N, NUM_CLASSES), logits.shape
    ref = jax.block_until_ready(ref_forward(x, params))
    assert jnp.allclose(logits, ref, rtol=5e-2, atol=1e-3), (
        "logits mismatch", float(jnp.max(jnp.abs(logits - ref))))

    print("KERNEL_OK")
</pallas_src>

<mosaic_0001>
module attributes {stable_mosaic.version = 11 : i64} {
  func.func @_conv_relu_pool_kernel(%arg0: i32, %arg1: memref<1x256x192xbf16, #tpu.memory_space<vmem>>, %arg2: memref<3x192x112xbf16, #tpu.memory_space<vmem>>, %arg3: memref<1x112xf32, #tpu.memory_space<vmem>>, %arg4: memref<49x224xbf16, #tpu.memory_space<vmem>>, %arg5: memref<112x56xbf16, #tpu.memory_space<vmem>>, %arg6: memref<1x49x56xbf16, #tpu.memory_space<vmem>>, %arg7: memref<224x112xf32, #tpu.memory_space<vmem>>) attributes {dimension_semantics = [#tpu.dimension_semantics<parallel>], iteration_bounds = array<i64: 2>, scalar_prefetch = 0 : i64, scratch_operands = 1 : i64, tpu.core_type = #tpu.core_type<tc>, window_params = [{transform_indices = @transform_0, window_bounds = array<i64: 1, 256, 192>}, {pipeline_mode = #tpu.pipeline_mode<synchronous>, transform_indices = @transform_1, window_bounds = array<i64: 3, 192, 112>}, {pipeline_mode = #tpu.pipeline_mode<synchronous>, transform_indices = @transform_2, window_bounds = array<i64: 1, 112>}, {pipeline_mode = #tpu.pipeline_mode<synchronous>, transform_indices = @transform_3, window_bounds = array<i64: 49, 224>}, {pipeline_mode = #tpu.pipeline_mode<synchronous>, transform_indices = @transform_4, window_bounds = array<i64: 112, 56>}, {transform_indices = @transform_5, window_bounds = array<i64: 1, 49, 56>}]} {
    %c0 = arith.constant 0 : index
    %c0_0 = arith.constant 0 : index
    %c0_1 = arith.constant 0 : index
    %0 = vector.load %arg1[%c0, %c0_0, %c0_1] : memref<1x256x192xbf16, #tpu.memory_space<vmem>>, vector<1x224x192xbf16>
    %1 = vector.shape_cast %0 : vector<1x224x192xbf16> to vector<224x192xbf16>
    %c0_2 = arith.constant 0 : index
    %c0_3 = arith.constant 0 : index
    %c0_4 = arith.constant 0 : index
    %2 = vector.load %arg2[%c0_2, %c0_3, %c0_4] : memref<3x192x112xbf16, #tpu.memory_space<vmem>>, vector<1x192x112xbf16>
    %3 = vector.shape_cast %2 : vector<1x192x112xbf16> to vector<192x112xbf16>
    %cst = arith.constant dense<0.000000e+00> : vector<224x112xf32>
    %4 = tpu.matmul %1, %3, %cst {dimension_numbers = #tpu.dot_dimension_numbers<[1], [0], [0], [1], [0, 0, 1, 1], [], []>} : vector<224x192xbf16>, vector<192x112xbf16>, vector<224x112xf32> -> vector<224x112xf32>
    %c0_5 = arith.constant 0 : index
    %c0_6 = arith.constant 0 : index
    %5 = vector.load %arg7[%c0_5, %c0_6] : memref<224x112xf32, #tpu.memory_space<vmem>>, vector<224x112xf32>
    tpu.vector_store %arg7[%c0_5, %c0_6], %4 {strides = array<i32>} : memref<224x112xf32, #tpu.memory_space<vmem>>, vector<224x112xf32>,
    %c0_7 = arith.constant 0 : index
    %c16 = arith.constant 16 : index
    %c0_8 = arith.constant 0 : index
    %6 = vector.load %arg1[%c0_7, %c16, %c0_8] : memref<1x256x192xbf16, #tpu.memory_space<vmem>>, vector<1x224x192xbf16>
    %7 = vector.shape_cast %6 : vector<1x224x192xbf16> to vector<224x192xbf16>
    %c1 = arith.constant 1 : index
    %c0_9 = arith.constant 0 : index
    %c0_10 = arith.constant 0 : index
    %8 = vector.load %arg2[%c1, %c0_9, %c0_10] : memref<3x192x112xbf16, #tpu.memory_space<vmem>>, vector<1x192x112xbf16>
    %9 = vector.shape_cast %8 : vector<1x192x112xbf16> to vector<192x112xbf16>
    %cst_11 = arith.constant dense<0.000000e+00> : vector<224x112xf32>
    %10 = tpu.matmul %7, %9, %cst_11 {dimension_numbers = #tpu.dot_dimension_numbers<[1], [0], [0], [1], [0, 0, 1, 1], [], []>} : vector<224x192xbf16>, vector<192x112xbf16>, vector<224x112xf32> -> vector<224x112xf32>
    %c0_12 = arith.constant 0 : index
    %c0_13 = arith.constant 0 : index
    %11 = vector.load %arg7[%c0_12, %c0_13] : memref<224x112xf32, #tpu.memory_space<vmem>>, vector<224x112xf32>
    %12 = arith.addf %11, %10 : vector<224x112xf32>
    %c0_14 = arith.constant 0 : index
    %c0_15 = arith.constant 0 : index
    %13 = vector.load %arg7[%c0_14, %c0_15] : memref<224x112xf32, #tpu.memory_space<vmem>>, vector<224x112xf32>
    tpu.vector_store %arg7[%c0_14, %c0_15], %12 {strides = array<i32>} : memref<224x112xf32, #tpu.memory_space<vmem>>, vector<224x112xf32>,
    %c0_16 = arith.constant 0 : index
    %c32 = arith.constant 32 : index
    %c0_17 = arith.constant 0 : index
    %14 = vector.load %arg1[%c0_16, %c32, %c0_17] : memref<1x256x192xbf16, #tpu.memory_space<vmem>>, vector<1x224x192xbf16>
    %15 = vector.shape_cast %14 : vector<1x224x192xbf16> to vector<224x192xbf16>
    %c2 = arith.constant 2 : index
    %c0_18 = arith.constant 0 : index
    %c0_19 = arith.constant 0 : index
    %16 = vector.load %arg2[%c2, %c0_18, %c0_19] : memref<3x192x112xbf16, #tpu.memory_space<vmem>>, vector<1x192x112xbf16>
    %17 = vector.shape_cast %16 : vector<1x192x112xbf16> to vector<192x112xbf16>
    %cst_20 = arith.constant dense<0.000000e+00> : vector<224x112xf32>
    %18 = tpu.matmul %15, %17, %cst_20 {dimension_numbers = #tpu.dot_dimension_numbers<[1], [0], [0], [1], [0, 0, 1, 1], [], []>} : vector<224x192xbf16>, vector<192x112xbf16>, vector<224x112xf32> -> vector<224x112xf32>
    %c0_21 = arith.constant 0 : index
    %c0_22 = arith.constant 0 : index
    %19 = vector.load %arg7[%c0_21, %c0_22] : memref<224x112xf32, #tpu.memory_space<vmem>>, vector<224x112xf32>
    %20 = arith.addf %19, %18 : vector<224x112xf32>
    %c0_23 = arith.constant 0 : index
    %c0_24 = arith.constant 0 : index
    %21 = vector.load %arg7[%c0_23, %c0_24] : memref<224x112xf32, #tpu.memory_space<vmem>>, vector<224x112xf32>
    tpu.vector_store %arg7[%c0_23, %c0_24], %20 {strides = array<i32>} : memref<224x112xf32, #tpu.memory_space<vmem>>, vector<224x112xf32>,
    %c0_25 = arith.constant 0 : index
    %c0_26 = arith.constant 0 : index
    %22 = vector.load %arg7[%c0_25, %c0_26] : memref<224x112xf32, #tpu.memory_space<vmem>>, vector<224x112xf32>
    %c0_27 = arith.constant 0 : index
    %c0_28 = arith.constant 0 : index
    %23 = vector.load %arg3[%c0_27, %c0_28] : memref<1x112xf32, #tpu.memory_space<vmem>>, vector<1x112xf32>
    %24 = vector.broadcast %23 : vector<1x112xf32> to vector<224x112xf32>
    %25 = arith.addf %22, %24 : vector<224x112xf32>
    %cst_29 = arith.constant 0.000000e+00 : f32
    %26 = vector.broadcast %cst_29 : f32 to vector<224x112xf32>
    %27 = arith.maximumf %25, %26 : vector<224x112xf32>
    %28 = arith.truncf %27 : vector<224x112xf32> to vector<224x112xbf16>
    %c0_30 = arith.constant 0 : index
    %c0_31 = arith.constant 0 : index
    %29 = vector.load %arg4[%c0_30, %c0_31] : memref<49x224xbf16, #tpu.memory_space<vmem>>, vector<49x224xbf16>
    %cst_32 = arith.constant dense<0.000000e+00> : vector<49x112xf32>
    %30 = tpu.matmul %29, %28, %cst_32 {dimension_numbers = #tpu.dot_dimension_numbers<[1], [0], [0], [1], [0, 0, 1, 1], [], []>} : vector<49x224xbf16>, vector<224x112xbf16>, vector<49x112xf32> -> vector<49x112xf32>
    %31 = arith.truncf %30 : vector<49x112xf32> to vector<49x112xbf16>
    %c0_33 = arith.constant 0 : index
    %c0_34 = arith.constant 0 : index
    %32 = vector.load %arg5[%c0_33, %c0_34] : memref<112x56xbf16, #tpu.memory_space<vmem>>, vector<112x56xbf16>
    %cst_35 = arith.constant dense<0.000000e+00> : vector<49x56xf32>
    %33 = tpu.matmul %31, %32, %cst_35 {dimension_numbers = #tpu.dot_dimension_numbers<[1], [0], [0], [1], [0, 0, 1, 1], [], []>} : vector<49x112xbf16>, vector<112x56xbf16>, vector<49x56xf32> -> vector<49x56xf32>
    %34 = arith.truncf %33 : vector<49x56xf32> to vector<49x56xbf16>
    %c0_36 = arith.constant 0 : index
    %c0_37 = arith.constant 0 : index
    %c0_38 = arith.constant 0 : index
    %35 = vector.load %arg6[%c0_36, %c0_37, %c0_38] : memref<1x49x56xbf16, #tpu.memory_space<vmem>>, vector<1x49x56xbf16>
    %36 = vector.shape_cast %35 : vector<1x49x56xbf16> to vector<49x56xbf16>
    %37 = vector.shape_cast %34 : vector<49x56xbf16> to vector<1x49x56xbf16>
    tpu.vector_store %arg6[%c0_36, %c0_37, %c0_38], %37 {strides = array<i32>} : memref<1x49x56xbf16, #tpu.memory_space<vmem>>, vector<1x49x56xbf16>,
    return
  }
  func.func @transform_0(%arg0: i32) -> (i32, i32, i32) {
    %c0_i32 = arith.constant 0 : i32
    %c0_i32_0 = arith.constant 0 : i32
    %c0_i32_1 = arith.constant 0 : i32
    return %arg0, %c0_i32, %c0_i32_0 : i32, i32, i32
  }
  func.func @transform_1(%arg0: i32) -> (i32, i32, i32) {
    %c0_i32 = arith.constant 0 : i32
    %c0_i32_0 = arith.constant 0 : i32
    %c0_i32_1 = arith.constant 0 : i32
    %c0_i32_2 = arith.constant 0 : i32
    return %c0_i32, %c0_i32_0, %c0_i32_1 : i32, i32, i32
  }
  func.func @transform_2(%arg0: i32) -> (i32, i32) {
    %c0_i32 = arith.constant 0 : i32
    %c0_i32_0 = arith.constant 0 : i32
    %c0_i32_1 = arith.constant 0 : i32
    return %c0_i32, %c0_i32_0 : i32, i32
  }
  func.func @transform_3(%arg0: i32) -> (i32, i32) {
    %c0_i32 = arith.constant 0 : i32
    %c0_i32_0 = arith.constant 0 : i32
    %c0_i32_1 = arith.constant 0 : i32
    return %c0_i32, %c0_i32_0 : i32, i32
  }
  func.func @transform_4(%arg0: i32) -> (i32, i32) {
    %c0_i32 = arith.constant 0 : i32
    %c0_i32_0 = arith.constant 0 : i32
    %c0_i32_1 = arith.constant 0 : i32
    return %c0_i32, %c0_i32_0 : i32, i32
  }
  func.func @transform_5(%arg0: i32) -> (i32, i32, i32) {
    %c0_i32 = arith.constant 0 : i32
    %c0_i32_0 = arith.constant 0 : i32
    %c0_i32_1 = arith.constant 0 : i32
    return %arg0, %c0_i32, %c0_i32_0 : i32, i32, i32
  }
}

</mosaic_0001>

<bundles_post_ra>
// kernel: conv3d_relu_avgpool.1
= control target key start
LH: loop header
LB: loop body
LE: loop exit
PB: predicated region body
PF: predicated region fallthrough
CT: control target
= control target key end

     0   :  { %s2992_s18 = smov 0   ;;  %s3660_s0 = inlined_call_operand.vmem [shape: bf16[2,256,192], index: 0, kind: input, shape index: {}]   ;;  %s3661_s1 = inlined_call_operand.vmem [shape: bf16[3,192,112], index: 1, kind: input, shape index: {}]   ;;  %s3662_s2 = inlined_call_operand.vmem [shape: f32[1,112], index: 2, kind: input, shape index: {}]   ;;  %s3663_s3 = inlined_call_operand.vmem [shape: bf16[49,224], index: 3, kind: input, shape index: {}]   ;;  %s3664_s4 = inlined_call_operand.vmem [shape: bf16[112,56], index: 4, kind: input, shape index: {}]   ;;  %s3665_s5 = inlined_call_operand.vmem [shape: bf16[2,49,56], index: 5, kind: output, shape index: {}]  }
   0x1 LB: > { %s2162_s19 = sadd.s32 4294967295, %s2960_s18   ;;  %p2166_p0 = scmp.ge.s32.totalorder %s2960_s18, 1  ;;  %s2960_s18 = sphi %s2992_s18, %s15_s18  }
   0x2   : > { %p187_p1 = scmp.lt.s32.totalorder %s2960_s18, 3 }
   0x4   : > { %p188_p2 = pnand %p2166_p0, %p187_p1 }
   0x5   : > { %p215_p3 = scmp.lt.s32.totalorder (!%p188_p2), %s2162_s19, 1 }
   0x6   : > { %191 = sbr.rel (%p188_p2) target bundleno = 921 (0x399), region = 40 }
   0xb   : > { %v2838_v0 = vld [vmem:[%s3661_s1 + $0x38] sm:$0xff]  ;;  %v2837_v3 = vld [vmem:[%s3661_s1 + $0x30] sm:$0xff]  ;;  %s3667_s19 = smov (!%p215_p3, %s2162_s19), 1  ;;  %v2836_v6 = vld [vmem:[%s3661_s1 + $0x28] sm:$0xff]  ;;  %vm476_vm0 = vcmask 523264   ;;  %vm677_vm1 = vcmask 916480  }
   0xc   : > { %v2842_v1 = vld [vmem:[%s3661_s1 + $0x58] sm:$0xff]  ;;  %519 = vmatpush.bf16.msra.mxu0 %v2838_v0  ;;  %v2841_v4 = vld [vmem:[%s3661_s1 + $0x50] sm:$0xff]  ;;  %s2802_s7 = sshll.u32 %s3667_s19, 8  ;;  %v2840_v7 = vld [vmem:[%s3661_s1 + $0x48] sm:$0xff]  ;;  %vm1918_vm2 = vcmask 785408   ;;  %s2944_s25 = smul.u32 28, %s3667_s19 }
   0xd   : > { %v3009_v2 = vld [vmem:[%s3661_s1 + $0xb8] sm:$0xff]  ;;  %602 = vmatpush.bf16.msra.mxu1 %v2842_v1  ;;  %2936 = vmatpush.bf16.msra.mxu2 %v2842_v1  ;;  %v3023_v5 = vld [vmem:[%s3661_s1 + $0xb0] sm:$0xff]  ;;  %v3036_v8 = vld [vmem:[%s3661_s1 + $0xa8] sm:$0xff]  ;;  %s3041_s16 = scalar_lea.vmem %s3660_s0, %s2802_s7  ;;  %vm2094_vm3 = vcmask 453632   ;;  %vm2101_vm4 = vcmask 450560  }
   0xe   : > { %2940 = vmatpush.bf16.msra.mxu3 %v3009_v2  ;;  %v2835_v9 = vld [vmem:[%s3661_s1 + $0x20] sm:$0xff]  ;;  %v2174_v13 = vld [vmem:[%s3041_s16 + $0x8] sm:$0xf0]  ;;  %v2825_v14 = vld [vmem:[%s3041_s16 + $0xb4] sm:$0xf]  ;;  %s224_s28 = scalar_lea.vmem %s3665_s5, %s2944_s25 }
   0xf   : > { %v2839_v10 = vld [vmem:[%s3661_s1 + $0x40] sm:$0xff]  ;;  %v2262_v15 = vld [vmem:[%s3041_s16 + $0xb8] sm:$0xf0]  ;;  %v2396_v17 = vld [vmem:[%s3041_s16 + $0x48] sm:$0xf0] }
  0x10   : > { %520 = vmatpush.bf16.msra.mxu0 %v2837_v3  ;;  %v3052_v11 = vld [vmem:[%s3661_s1 + $0xa0] sm:$0xff]  ;;  %v2878_v18 = vld [vmem:[%s3661_s1 + $0x98] sm:$0xff]  ;;  %v2265_v20 = vor.u32 %v2825_v14, %v2262_v15  ;;  %v2877_v23 = vld [vmem:[%s3661_s1 + $0x90] sm:$0xff]  ;;  %vm2102_vm5 = vsmask.f32 256 }
  0x11   : > { %603 = vmatpush.bf16.msra.mxu1 %v2841_v4  ;;  %2937 = vmatpush.bf16.msra.mxu2 %v2841_v4  ;;  %v2803_v12 = vld [vmem:[%s3041_s16 + $0x4] sm:$0xf]  ;;  %v2834_v22 = vld [vmem:[%s3661_s1 + $0x18] sm:$0xff]  ;;  %v2833_v24 = vld [vmem:[%s3661_s1 + $0x10] sm:$0xff] }
  0x12   : > { %2941 = vmatpush.bf16.msra.mxu3 %v3023_v5  ;;  %v2849_v16 = vld [vmem:[%s3041_s16 + $0x44] sm:$0xf]  ;;  %v2177_v19 = vor.u32 %v2803_v12, %v2174_v13  ;;  %v2876_v25 = vld [vmem:[%s3661_s1 + $0x88] sm:$0xff]  ;;  %v2172_v29 = vld [vmem:[%s3041_s16] sm:$0xf] }
  0x13   : > { %v2399_v21 = vor.u32 %v2849_v16, %v2396_v17  ;;  %v2832_v26 = vld [vmem:[%s3661_s1 + $0x8] sm:$0xff]  ;;  %v2875_v27 = vld [vmem:[%s3661_s1 + $0x80] sm:$0xff]  ;;  %v2805_v30 = vld [vmem:[%s3041_s16 + $0x14] sm:$0xf] }
  0x14   : > { %521 = vmatpush.bf16.msra.mxu0 %v2836_v6  ;;  %v2831_v28 = vld [vmem:[%s3661_s1] sm:$0xff]  ;;  %v2182_v31 = vld [vmem:[%s3041_s16 + $0x18] sm:$0xf0]  ;;  %v2804_v32 = vld [vmem:[%s3041_s16 + $0x4] sm:$0xf0] }
  0x15   : > { %604 = vmatpush.bf16.msra.mxu1 %v2840_v7  ;;  %2938 = vmatpush.bf16.msra.mxu2 %v2840_v7  ;;  %v2827_v33 = vld [vmem:[%s3041_s16 + $0xc4] sm:$0xf]  ;;  %v2270_v34 = vld [vmem:[%s3041_s16 + $0xc8] sm:$0xf0]  ;;  %v2851_v35 = vld [vmem:[%s3041_s16 + $0x54] sm:$0xf]  ;;  %v2185_v38 = vor.u32 %v2805_v30, %v2182_v31  ;;  %v2173_v39 = vor.u32 %v2804_v32, %v2172_v29 }
  0x16   : > { %2942 = vmatpush.bf16.msra.mxu3 %v3036_v8  ;;  %v2404_v36 = vld [vmem:[%s3041_s16 + $0x58] sm:$0xf0]  ;;  %v2273_v40 = vor.u32 %v2827_v33, %v2270_v34  ;;  %v2873_v42 = vld [vmem:[%s3661_s1 + $0x70] sm:$0xff]  ;;  %v2872_v43 = vld [vmem:[%s3661_s1 + $0x68] sm:$0xff] }
  0x17   : > { %v2874_v37 = vld [vmem:[%s3661_s1 + $0x78] sm:$0xff]  ;;  %v2407_v41 = vor.u32 %v2851_v35, %v2404_v36  ;;  %v2871_v44 = vld [vmem:[%s3661_s1 + $0x60] sm:$0xff]  ;;  %v2180_v45 = vld [vmem:[%s3041_s16 + $0x10] sm:$0xf] }
  0x18   : > { %522 = vmatpush.bf16.msra.mxu0 %v2835_v9  ;;  %v2807_v46 = vld [vmem:[%s3041_s16 + $0x24] sm:$0xf]  ;;  %v2190_v47 = vld [vmem:[%s3041_s16 + $0x28] sm:$0xf0]  ;;  %v2806_v48 = vld [vmem:[%s3041_s16 + $0x14] sm:$0xf0] }
  0x19   : > { %605 = vmatpush.bf16.msra.mxu1 %v2839_v10  ;;  %2939 = vmatpush.bf16.msra.mxu2 %v2839_v10  ;;  %v2829_v49 = vld [vmem:[%s3041_s16 + $0xd4] sm:$0xf]  ;;  %v2278_v50 = vld [vmem:[%s3041_s16 + $0xd8] sm:$0xf0]  ;;  %v2853_v51 = vld [vmem:[%s3041_s16 + $0x64] sm:$0xf]  ;;  %v2193_v53 = vor.u32 %v2807_v46, %v2190_v47  ;;  %v2181_v54 = vor.u32 %v2806_v48, %v2180_v45 }
  0x1a   : > { %2943 = vmatpush.bf16.msra.mxu3 %v3052_v11  ;;  %v2412_v52 = vld [vmem:[%s3041_s16 + $0x68] sm:$0xf0]  ;;  %v2281_v55 = vor.u32 %v2829_v49, %v2278_v50  ;;  %v2188_v57 = vld [vmem:[%s3041_s16 + $0x20] sm:$0xf]  ;;  %v2809_v58 = vld [vmem:[%s3041_s16 + $0x34] sm:$0xf] }
  0x1b   : > { %v2415_v56 = vor.u32 %v2853_v51, %v2412_v52  ;;  %v2198_v59 = vld [vmem:[%s3041_s16 + $0x38] sm:$0xf0]  ;;  %v2808_v60 = vld [vmem:[%s3041_s16 + $0x24] sm:$0xf0]  ;;  %v2370_v61 = vld [vmem:[%s3041_s16 + $0x10] sm:$0xf] }
  0x1c   : > { %2330 = vmatmul.msk.bf16.vlgmr.msra.gmra.mxu1 %vm476_vm0, %v2177_v19  ;;  %2341 = vmatmul.msk.bf16.vlgmr.msra.gmra.mxu2 %vm476_vm0, %v2265_v20  ;;  %v2844_v62 = vld [vmem:[%s3041_s16 + $0x14] sm:$0xf0]  ;;  %v2855_v63 = vld [vmem:[%s3041_s16 + $0x74] sm:$0xf]  ;;  %v2420_v0 = vld [vmem:[%s3041_s16 + $0x78] sm:$0xf0]  ;;  %v2201_v1 = vor.u32 %v2809_v58, %v2198_v59 }
  0x1d   : > { %999 = vmatpush.bf16.msrb.mxu2 %v2878_v18  ;;  %2531 = vmatmul.msk.bf16.vlgmr.msra.gmra.mxu3 %vm476_vm0, %v2399_v21  ;;  %v2371_v3 = vor.u32 %v2844_v62, %v2370_v61  ;;  %v2423_v4 = vor.u32 %v2855_v63, %v2420_v0  ;;  %v2811_v6 = vld [vmem:[%s3041_s16 + $0x44] sm:$0xf]  ;;  %v2206_v7 = vld [vmem:[%s3041_s16 + $0x48] sm:$0xf0]  ;;  %v2378_v9 = vld [vmem:[%s3041_s16 + $0x20] sm:$0xf] }
  0x1e   : > { %523 = vmatpush.bf16.msra.mxu0 %v2834_v22  ;;  %v2846_v10 = vld [vmem:[%s3041_s16 + $0x24] sm:$0xf0]  ;;  %v2428_v12 = vld [vmem:[%s3041_s16 + $0x88] sm:$0xf0]  ;;  %v2209_v13 = vor.u32 %v2811_v6, %v2206_v7  ;;  %v2922_v17 = vld [vmem:[%s3661_s1 + $0x118] sm:$0xff] }
  0x1f   : > { %v2379_v15 = vor.u32 %v2846_v10, %v2378_v9  ;;  %v2918_v18 = vld [vmem:[%s3661_s1 + $0xf8] sm:$0xff]  ;;  %1617 = vmatpush.bf16.msrb.mxu3 %v2922_v17  ;;  %v2204_v19 = vld [vmem:[%s3041_s16 + $0x40] sm:$0xf]  ;;  %v2813_v20 = vld [vmem:[%s3041_s16 + $0x54] sm:$0xf] }
  0x20   : > { %1534 = vmatpush.bf16.msrb.mxu1 %v2918_v18  ;;  %v2214_v21 = vld [vmem:[%s3041_s16 + $0x58] sm:$0xf0]  ;;  %v2812_v22 = vld [vmem:[%s3041_s16 + $0x44] sm:$0xf0]  ;;  %v2212_v31 = vld [vmem:[%s3041_s16 + $0x50] sm:$0xf] }
  0x21   : > { %1000 = vmatpush.bf16.msrb.mxu2 %v2877_v23  ;;  %v2386_v23 = vld [vmem:[%s3041_s16 + $0x30] sm:$0xf]  ;;  %v2815_v32 = vld [vmem:[%s3041_s16 + $0x64] sm:$0xf]  ;;  %v2222_v33 = vld [vmem:[%s3041_s16 + $0x68] sm:$0xf0] }
  0x22   : > { %524 = vmatpush.bf16.msra.mxu0 %v2833_v24  ;;  %v2848_v24 = vld [vmem:[%s3041_s16 + $0x34] sm:$0xf0]  ;;  %v2394_v35 = vld [vmem:[%s3041_s16 + $0x40] sm:$0xf]  ;;  %v2850_v36 = vld [vmem:[%s3041_s16 + $0x44] sm:$0xf0] }
  0x23   : > { %v2387_v29 = vor.u32 %v2848_v24, %v2386_v23  ;;  %v2814_v34 = vld [vmem:[%s3041_s16 + $0x54] sm:$0xf0]  ;;  %v2817_v45 = vld [vmem:[%s3041_s16 + $0x74] sm:$0xf]  ;;  %v2230_v46 = vld [vmem:[%s3041_s16 + $0x78] sm:$0xf0] }
  0x24   : > { %v2816_v47 = vld [vmem:[%s3041_s16 + $0x64] sm:$0xf0]  ;;  %v2402_v48 = vld [vmem:[%s3041_s16 + $0x50] sm:$0xf]  ;;  %v2852_v49 = vld [vmem:[%s3041_s16 + $0x54] sm:$0xf0]  ;;  %v2233_v52 = vor.u32 %v2817_v45, %v2230_v46 }
  0x25   : > { %1001 = vmatpush.bf16.msrb.mxu2 %v2876_v25  ;;  %v2859_v25 = vld [vmem:[%s3041_s16 + $0x94] sm:$0xf]  ;;  %v2452_v51 = vld [vmem:[%s3041_s16 + $0xb8] sm:$0xf0]  ;;  %v2819_v58 = vld [vmem:[%s3041_s16 + $0x84] sm:$0xf] }
  0x26   : > { %525 = vmatpush.bf16.msra.mxu0 %v2832_v26  ;;  %v2436_v26 = vld [vmem:[%s3041_s16 + $0x98] sm:$0xf0]  ;;  %v2863_v50 = vld [vmem:[%s3041_s16 + $0xb4] sm:$0xf]  ;;  %v2238_v59 = vld [vmem:[%s3041_s16 + $0x88] sm:$0xf0] }
  0x27   : > { %v2439_v30 = vor.u32 %v2859_v25, %v2436_v26  ;;  %v2818_v61 = vld [vmem:[%s3041_s16 + $0x74] sm:$0xf0]  ;;  %v2410_v62 = vld [vmem:[%s3041_s16 + $0x60] sm:$0xf]  ;;  %v2854_v63 = vld [vmem:[%s3041_s16 + $0x64] sm:$0xf0] }
  0x28   : > { %v2865_v0 = vld [vmem:[%s3041_s16 + $0xc4] sm:$0xf]  ;;  %v2920_v17 = vld [vmem:[%s3661_s1 + $0x108] sm:$0xff]  ;;  %vm2103_vm6 = vmand %vm2101_vm4, %vm2102_vm5 }
  0x29   : > { %1002 = vmatpush.bf16.msrb.mxu2 %v2875_v27  ;;  %v2217_v27 = vor.u32 %v2813_v20, %v2214_v21  ;;  %v2915_v6 = vld [vmem:[%s3661_s1 + $0xe0] sm:$0xff]  ;;  %v2820_v18 = vld [vmem:[%s3041_s16 + $0x84] sm:$0xf0]  ;;  %v2856_v20 = vld [vmem:[%s3041_s16 + $0x74] sm:$0xf0] }
  0x2a   : > { %526 = vmatpush.bf16.msra.mxu0 %v2831_v28  ;;  %v2205_v28 = vor.u32 %v2812_v22, %v2204_v19  ;;  %v2418_v19 = vld [vmem:[%s3041_s16 + $0x70] sm:$0xf]  ;;  %v2867_v21 = vld [vmem:[%s3041_s16 + $0xd4] sm:$0xf]  ;;  %v2468_v22 = vld [vmem:[%s3041_s16 + $0xd8] sm:$0xf0] }
  0x2b   : > { %v2869_v45 = vld [vmem:[%s3041_s16 + $0xe4] sm:$0xf]  ;;  %v2476_v46 = vld [vmem:[%s3041_s16 + $0xe8] sm:$0xf0] }
  0x2c   : > { %2331 = vmatmul.msk.bf16.gmra.mxu1 %vm476_vm0, %v2185_v38  ;;  %2342 = vmatmul.msk.bf16.gmra.mxu2 %vm476_vm0, %v2273_v40  ;;  %v2444_v38 = vld [vmem:[%s3041_s16 + $0xa8] sm:$0xf0]  ;;  %v2213_v40 = vor.u32 %v2814_v34, %v2212_v31 }
  0x2d   : > { %1003 = vmatpush.bf16.msrb.mxu2 %v2874_v37  ;;  %527 = vmatmul.bf16.vlgmr.msra.gmra.mxu0 %v2173_v39  ;;  %v2861_v37 = vld [vmem:[%s3041_s16 + $0xa4] sm:$0xf]  ;;  %v2225_v39 = vor.u32 %v2815_v32, %v2222_v33  ;;  %v2471_v32 = vor.u32 %v2867_v21, %v2468_v22  ;;  %v2260_v21 = vld [vmem:[%s3041_s16 + $0xb0] sm:$0xf] }
  0x2e   : > { %2532 = vmatmul.msk.bf16.gmra.mxu3 %vm476_vm0, %v2407_v41  ;;  %v2395_v41 = vor.u32 %v2850_v36, %v2394_v35  ;;  %v2576_v22 = vld [vmem:[%s3041_s16 + $0x30] sm:$0xf] }
  0x31   : > { %1004 = vmatpush.bf16.msrb.mxu2 %v2873_v42  ;;  %v2917_v42 = vld [vmem:[%s3661_s1 + $0xf0] sm:$0xff] }
  0x32   : > { %1535 = vmatpush.bf16.msrb.mxu1 %v2917_v42  ;;  %v2822_v42 = vld [vmem:[%s3041_s16 + $0x94] sm:$0xf0] }
  0x35   : > { %1005 = vmatpush.bf16.msrb.mxu2 %v2872_v43  ;;  %v2447_v43 = vor.u32 %v2861_v37, %v2444_v38 }
  0x39   : > { %1006 = vmatpush.bf16.msrb.mxu2 %v2871_v44  ;;  %v2220_v44 = vld [vmem:[%s3041_s16 + $0x60] sm:$0xf] }
  0x3c   : > { %2332 = vmatmul.msk.bf16.gmra.mxu1 %vm476_vm0, %v2193_v53  ;;  %2343 = vmatmul.msk.bf16.gmra.mxu2 %vm476_vm0, %v2281_v55  ;;  %v2221_v53 = vor.u32 %v2816_v47, %v2220_v44  ;;  %v2455_v55 = vor.u32 %v2863_v50, %v2452_v51  ;;  %v2858_v44 = vld [vmem:[%s3041_s16 + $0x84] sm:$0xf0] }
  0x3d   : > { %1082 = vmatpush.bf16.msra.mxu2 %v3009_v2  ;;  %532 = vmatmul.bf16.gmra.mxu0 %v2181_v54  ;;  %v2189_v2 = vor.u32 %v2808_v60, %v2188_v57  ;;  %v2403_v54 = vor.u32 %v2852_v49, %v2402_v48  ;;  %v2228_v57 = vld [vmem:[%s3041_s16 + $0x70] sm:$0xf]  ;;  %v2916_v60 = vld [vmem:[%s3661_s1 + $0xe8] sm:$0xff] }
  0x3e   : > { %2533 = vmatmul.msk.bf16.gmra.mxu3 %vm476_vm0, %v2415_v56  ;;  %v2921_v56 = vld [vmem:[%s3661_s1 + $0x110] sm:$0xff]  ;;  %1536 = vmatpush.bf16.msrb.mxu1 %v2916_v60 }
  0x3f   : > { %1618 = vmatpush.bf16.msrb.mxu3 %v2921_v56 }
  0x41   : > { %1083 = vmatpush.bf16.msra.mxu2 %v3023_v5  ;;  %v2196_v5 = vld [vmem:[%s3041_s16 + $0x30] sm:$0xf] }
  0x42   : > { %1537 = vmatpush.bf16.msrb.mxu1 %v2915_v6 }
  0x43   : > { %1619 = vmatpush.bf16.msrb.mxu3 %v2920_v17 }
  0x45   : > { %1084 = vmatpush.bf16.msra.mxu2 %v3036_v8  ;;  %v2810_v8 = vld [vmem:[%s3041_s16 + $0x34] sm:$0xf0] }
  0x46   : > { %v2197_v14 = vor.u32 %v2810_v8, %v2196_v5  ;;  %v2411_v5 = vor.u32 %v2854_v63, %v2410_v62  ;;  %v2914_v8 = vld [vmem:[%s3661_s1 + $0xd8] sm:$0xff]  ;;  %v2568_v62 = vld [vmem:[%s3041_s16 + $0x20] sm:$0xf]  ;;  %v2884_v63 = vld [vmem:[%s3041_s16 + $0x24] sm:$0xf0] }
  0x47   : > { %1538 = vmatpush.bf16.msrb.mxu1 %v2914_v8  ;;  %v2569_v6 = vor.u32 %v2884_v63, %v2568_v62 }
  0x49   : > { %1085 = vmatpush.bf16.msra.mxu2 %v3052_v11  ;;  %v2857_v11 = vld [vmem:[%s3041_s16 + $0x84] sm:$0xf] }
  0x4a   : > { %v2431_v16 = vor.u32 %v2857_v11, %v2428_v12  ;;  %v2913_v12 = vld [vmem:[%s3661_s1 + $0xd0] sm:$0xff] }
  0x4b   : > { %1539 = vmatpush.bf16.msrb.mxu1 %v2913_v12 }
  0x4c   : > { %2333 = vmatmul.msk.bf16.gmra.mxu1 %vm476_vm0, %v2201_v1  ;;  %1007 = vmatmul.bf16.vlgmr.msrb.gmra.mxu2 %v2371_v3  ;;  %v2460_v1 = vld [vmem:[%s3041_s16 + $0xc8] sm:$0xf0] }
  0x4d   : > { %537 = vmatmul.bf16.gmra.mxu0 %v2189_v2  ;;  %v2241_v2 = vor.u32 %v2819_v58, %v2238_v59  ;;  %v2463_v7 = vor.u32 %v2865_v0, %v2460_v1  ;;  %v2824_v0 = vld [vmem:[%s3041_s16 + $0xa4] sm:$0xf0]  ;;  %v2434_v1 = vld [vmem:[%s3041_s16 + $0x90] sm:$0xf] }
  0x4e   : > { %2534 = vmatmul.msk.bf16.gmra.mxu3 %vm476_vm0, %v2423_v4  ;;  %v2229_v4 = vor.u32 %v2818_v61, %v2228_v57  ;;  %v2252_v61 = vld [vmem:[%s3041_s16 + $0xa0] sm:$0xf] }
  0x5c   : > { %2334 = vmatmul.msk.bf16.gmra.mxu1 %vm476_vm0, %v2209_v13  ;;  %1012 = vmatmul.bf16.gmra.mxu2 %v2379_v15  ;;  %v2236_v13 = vld [vmem:[%s3041_s16 + $0x80] sm:$0xf]  ;;  %v2246_v15 = vld [vmem:[%s3041_s16 + $0x98] sm:$0xf0] }
  0x5d   : > { %542 = vmatmul.bf16.gmra.mxu0 %v2197_v14  ;;  %v2821_v14 = vld [vmem:[%s3041_s16 + $0x94] sm:$0xf] }
  0x5e   : > { %2535 = vmatmul.msk.bf16.gmra.mxu3 %vm476_vm0, %v2431_v16  ;;  %v2912_v16 = vld [vmem:[%s3661_s1 + $0xc8] sm:$0xff]  ;;  %v2249_v25 = vor.u32 %v2821_v14, %v2246_v15 }
  0x5f   : > { %1540 = vmatpush.bf16.msrb.mxu1 %v2912_v16 }
  0x6c   : > { %2335 = vmatmul.msk.bf16.gmra.mxu1 %vm476_vm0, %v2217_v27  ;;  %1017 = vmatmul.bf16.gmra.mxu2 %v2387_v29  ;;  %v2237_v27 = vor.u32 %v2820_v18, %v2236_v13  ;;  %v2911_v29 = vld [vmem:[%s3661_s1 + $0xc0] sm:$0xff] }
  0x6d   : > { %547 = vmatmul.bf16.gmra.mxu0 %v2205_v28  ;;  %v2419_v28 = vor.u32 %v2856_v20, %v2418_v19  ;;  %1541 = vmatpush.bf16.msrb.mxu1 %v2911_v29  ;;  %v2885_v29 = vld [vmem:[%s3041_s16 + $0x34] sm:$0xf] }
  0x6e   : > { %2536 = vmatmul.msk.bf16.gmra.mxu3 %vm476_vm0, %v2439_v30  ;;  %v2919_v30 = vld [vmem:[%s3661_s1 + $0x100] sm:$0xff] }
  0x6f   : > { %1620 = vmatpush.bf16.msrb.mxu3 %v2919_v30  ;;  %v2578_v30 = vld [vmem:[%s3041_s16 + $0x38] sm:$0xf0] }
  0x7c   : > { %2336 = vmatmul.msk.bf16.gmra.mxu1 %vm476_vm0, %v2225_v39  ;;  %1022 = vmatmul.bf16.gmra.mxu2 %v2395_v41  ;;  %v2244_v39 = vld [vmem:[%s3041_s16 + $0x90] sm:$0xf]  ;;  %v2254_v41 = vld [vmem:[%s3041_s16 + $0xa8] sm:$0xf0] }
  0x7d   : > { %552 = vmatmul.bf16.gmra.mxu0 %v2213_v40  ;;  %v2823_v40 = vld [vmem:[%s3041_s16 + $0xa4] sm:$0xf]  ;;  %v2245_v51 = vor.u32 %v2822_v42, %v2244_v39 }
  0x7e   : > { %2537 = vmatmul.msk.bf16.gmra.mxu3 %vm476_vm0, %v2447_v43  ;;  %v2426_v43 = vld [vmem:[%s3041_s16 + $0x80] sm:$0xf]  ;;  %v2257_v48 = vor.u32 %v2823_v40, %v2254_v41  ;;  %v2581_v40 = vor.u32 %v2885_v29, %v2578_v30 }
  0x8c   : > { %2337 = vmatmul.msk.bf16.gmra.mxu1 %vm476_vm0, %v2233_v52  ;;  %1027 = vmatmul.bf16.gmra.mxu2 %v2403_v54  ;;  %v2427_v52 = vor.u32 %v2858_v44, %v2426_v43  ;;  %v2479_v54 = vor.u32 %v2869_v45, %v2476_v46 }
  0x8d   : > { %557 = vmatmul.bf16.gmra.mxu0 %v2221_v53 }
  0x8e   : > { %2538 = vmatmul.msk.bf16.gmra.mxu3 %vm476_vm0, %v2455_v55 }
  0x99   : > { %v607_v3 = vpop.f32.mrf.mxu1 }
  0x9c   : > { %2338 = vmatmul.msk.bf16.gmra.mxu1 %vm476_vm0, %v2241_v2  ;;  %1032 = vmatmul.bf16.gmra.mxu2 %v2411_v5  ;;  %v2860_v2 = vld [vmem:[%s3041_s16 + $0x94] sm:$0xf0] }
  0x9d   : > { %562 = vmatmul.bf16.gmra.mxu0 %v2229_v4  ;;  %v2570_v4 = vld [vmem:[%s3041_s16 + $0x28] sm:$0xf0]  ;;  %v2435_v12 = vor.u32 %v2860_v2, %v2434_v1 }
  0x9e   : > { %2539 = vmatmul.msk.bf16.gmra.mxu3 %vm476_vm0, %v2463_v7 }
  0x9f   : > { %v3208_v9 = vpop.f32.mrf.mxu2 }
  0xa0   : > { %v3210_v10 = vpop.f32.mrf.mxu3 }
  0xa1   : > { %v609_v11 = vpop.f32.mrf.mxu1 }
  0xa7   : > { %v3229_v23 = vpop.f32.mrf.mxu2 }
  0xa8   : > { %v3231_v24 = vpop.f32.mrf.mxu3 }
  0xa9   : > { %v612_v26 = vpop.f32.mrf.mxu1 }
  0xaa   : > { %v528_v31 = vpop.f32.mrf.mxu0 }
  0xab   : > { %v608_v33 = vadd.f32 %v607_v3, %v528_v31  ;;  %v2883_v3 = vld [vmem:[%s3041_s16 + $0x24] sm:$0xf] }
  0xac   : > { %2339 = vmatmul.msk.bf16.gmra.mxu1 %vm476_vm0, %v2249_v25  ;;  %1037 = vmatmul.bf16.gmra.mxu2 %v2419_v28  ;;  %v2573_v14 = vor.u32 %v2883_v3, %v2570_v4  ;;  %v2886_v25 = vld [vmem:[%s3041_s16 + $0x34] sm:$0xf0]  ;;  %v2862_v28 = vld [vmem:[%s3041_s16 + $0xa4] sm:$0xf0] }
  0xad   : > { %678 = vst.msk [vmem:[#allocation2] sm:$0xff] %vm677_vm1, %v608_v33  ;;  %567 = vmatmul.bf16.gmra.mxu0 %v2237_v27  ;;  %v2442_v27 = vld [vmem:[%s3041_s16 + $0xa0] sm:$0xf] }
  0xae   : > { %2540 = vmatmul.msk.bf16.gmra.mxu3 %vm476_vm0, %v2471_v32  ;;  %v2577_v32 = vor.u32 %v2886_v25, %v2576_v22  ;;  %v2594_v22 = vld [vmem:[%s3041_s16 + $0x58] sm:$0xf0] }
  0xaf   : > { %v3242_v34 = vpop.f32.mrf.mxu2 }
  0xb1   : > { %v3244_v35 = vpop.f32.mrf.mxu3  ;;  %v614_v36 = vpop.f32.mrf.mxu1 }
  0xb2   : > { %v530_v37 = vpop.f32.mrf.mxu0 }
  0xb3   : > { %v610_v38 = vadd.f32 %v609_v11, %v530_v37  ;;  %v2253_v11 = vor.u32 %v2824_v0, %v2252_v61 }
  0xb5   : > { %679 = vst.msk [vmem:[#allocation2 + $0x8] sm:$0xff] %vm677_vm1, %v610_v38  ;;  %v2443_v38 = vor.u32 %v2862_v28, %v2442_v27 }
  0xb7   : > { %v3255_v47 = vpop.f32.mrf.mxu2 }
  0xb9   : > { %v3257_v49 = vpop.f32.mrf.mxu3  ;;  %v617_v50 = vpop.f32.mrf.mxu1 }
  0xba   : > { %v533_v53 = vpop.f32.mrf.mxu0 }
  0xbb   : > { %v613_v55 = vadd.f32 %v612_v26, %v533_v53  ;;  %v2826_v26 = vld [vmem:[%s3041_s16 + $0xb4] sm:$0xf0]  ;;  %v2450_v53 = vld [vmem:[%s3041_s16 + $0xb0] sm:$0xf] }
  0xbc   : > { %2340 = vmatmul.msk.bf16.gmra.mxu1 %vm476_vm0, %v2257_v48  ;;  %1042 = vmatmul.bf16.gmra.mxu2 %v2427_v52  ;;  %v2261_v37 = vor.u32 %v2826_v26, %v2260_v21  ;;  %v2268_v48 = vld [vmem:[%s3041_s16 + $0xc0] sm:$0xf]  ;;  %v2828_v52 = vld [vmem:[%s3041_s16 + $0xc4] sm:$0xf0]  ;;  %v2889_v21 = vld [vmem:[%s3041_s16 + $0x54] sm:$0xf] }
  0xbd   : > { %680 = vst.msk [vmem:[#allocation2 + $0x10] sm:$0xff] %vm677_vm1, %v613_v55  ;;  %572 = vmatmul.bf16.gmra.mxu0 %v2245_v51  ;;  %v2888_v51 = vld [vmem:[%s3041_s16 + $0x44] sm:$0xf0]  ;;  %v2887_v55 = vld [vmem:[%s3041_s16 + $0x44] sm:$0xf]  ;;  %v2269_v63 = vor.u32 %v2828_v52, %v2268_v48 }
  0xbe   : > { %2541 = vmatmul.msk.bf16.gmra.mxu3 %vm476_vm0, %v2479_v54  ;;  %v2864_v54 = vld [vmem:[%s3041_s16 + $0xb4] sm:$0xf0]  ;;  %v2466_v52 = vld [vmem:[%s3041_s16 + $0xd0] sm:$0xf] }
  0xbf   : > { %v3262_v56 = vpop.f32.mrf.mxu2  ;;  %v2451_v0 = vor.u32 %v2864_v54, %v2450_v53  ;;  %v2868_v53 = vld [vmem:[%s3041_s16 + $0xd4] sm:$0xf0]  ;;  %v2891_v54 = vld [vmem:[%s3041_s16 + $0x64] sm:$0xf] }
  0xc1   : > { %v3264_v57 = vpop.f32.mrf.mxu3  ;;  %v619_v58 = vpop.f32.mrf.mxu1 }
  0xc2   : > { %v535_v59 = vpop.f32.mrf.mxu0 }
  0xc3   : > { %v615_v60 = vadd.f32 %v614_v36, %v535_v59 }
  0xc5   : > { %681 = vst.msk [vmem:[#allocation2 + $0x18] sm:$0xff] %vm677_vm1, %v615_v60 }
  0xc7   : > { %v3275_v5 = vpop.f32.mrf.mxu2 }
  0xc9   : > { %v3277_v7 = vpop.f32.mrf.mxu3  ;;  %v622_v8 = vpop.f32.mrf.mxu1 }
  0xca   : > { %v538_v13 = vpop.f32.mrf.mxu0 }
  0xcb   : > { %v618_v15 = vadd.f32 %v617_v50, %v538_v13  ;;  %v2584_v50 = vld [vmem:[%s3041_s16 + $0x40] sm:$0xf]  ;;  %v2276_v13 = vld [vmem:[%s3041_s16 + $0xd0] sm:$0xf] }
  0xcc   : > { %1542 = vmatmul.bf16.vlgmr.msrb.gmra.mxu1 %v2569_v6  ;;  %1047 = vmatmul.bf16.gmra.mxu2 %v2435_v12  ;;  %v2585_v60 = vor.u32 %v2888_v51, %v2584_v50  ;;  %v2600_v50 = vld [vmem:[%s3041_s16 + $0x60] sm:$0xf]  ;;  %v2892_v51 = vld [vmem:[%s3041_s16 + $0x64] sm:$0xf0] }
  0xcd   : > { %682 = vst.msk [vmem:[#allocation2 + $0x20] sm:$0xff] %vm677_vm1, %v618_v15  ;;  %577 = vmatmul.bf16.gmra.mxu0 %v2253_v11  ;;  %v2890_v15 = vld [vmem:[%s3041_s16 + $0x54] sm:$0xf0] }
  0xce   : > { %2726 = vmatmul.msk.bf16.vlgmr.msrb.gmra.mxu3 %vm476_vm0, %v2573_v14  ;;  %v2592_v14 = vld [vmem:[%s3041_s16 + $0x50] sm:$0xf] }
  0xcf   : > { %v3281_v16 = vpop.f32.mrf.mxu2  ;;  %v2593_v26 = vor.u32 %v2890_v15, %v2592_v14 }
  0xd1   : > { %v3283_v17 = vpop.f32.mrf.mxu3  ;;  %v624_v18 = vpop.f32.mrf.mxu1 }
  0xd2   : > { %v540_v19 = vpop.f32.mrf.mxu0 }
  0xd3   : > { %v620_v20 = vadd.f32 %v619_v58, %v540_v19  ;;  %v2586_v58 = vld [vmem:[%s3041_s16 + $0x48] sm:$0xf0]  ;;  %v2458_v19 = vld [vmem:[%s3041_s16 + $0xc0] sm:$0xf] }
  0xd4   : > { %v2589_v2 = vor.u32 %v2887_v55, %v2586_v58  ;;  %v2602_v55 = vld [vmem:[%s3041_s16 + $0x68] sm:$0xf0] }
  0xd5   : > { %683 = vst.msk [vmem:[#allocation2 + $0x28] sm:$0xff] %vm677_vm1, %v620_v20  ;;  %v2866_v20 = vld [vmem:[%s3041_s16 + $0xc4] sm:$0xf0] }
  0xd6   : > { %v2459_v30 = vor.u32 %v2866_v20, %v2458_v19 }
  0xd7   : > { %v3294_v31 = vpop.f32.mrf.mxu2 }
  0xd9   : > { %v3296_v33 = vpop.f32.mrf.mxu3  ;;  %v627_v36 = vpop.f32.mrf.mxu1 }
  0xda   : > { %v543_v39 = vpop.f32.mrf.mxu0 }
  0xdb   : > { %v623_v41 = vadd.f32 %v622_v8, %v543_v39 }
  0xdc   : > { %1547 = vmatmul.bf16.gmra.mxu1 %v2577_v32  ;;  %1052 = vmatmul.bf16.gmra.mxu2 %v2443_v38 }
  0xdd   : > { %684 = vst.msk [vmem:[#allocation2 + $0x30] sm:$0xff] %vm677_vm1, %v623_v41  ;;  %582 = vmatmul.bf16.gmra.mxu0 %v2261_v37 }
  0xde   : > { %2727 = vmatmul.msk.bf16.gmra.mxu3 %vm476_vm0, %v2581_v40 }
  0xdf   : > { %v3300_v42 = vpop.f32.mrf.mxu2 }
  0xe1   : > { %v3302_v43 = vpop.f32.mrf.mxu3  ;;  %v629_v44 = vpop.f32.mrf.mxu1 }
  0xe2   : > { %v545_v45 = vpop.f32.mrf.mxu0 }
  0xe3   : > { %v625_v46 = vadd.f32 %v624_v18, %v545_v45  ;;  %v2830_v18 = vld [vmem:[%s3041_s16 + $0xd4] sm:$0xf0] }
  0xe4   : > { %v2277_v29 = vor.u32 %v2830_v18, %v2276_v13 }
  0xe5   : > { %685 = vst.msk [vmem:[#allocation2 + $0x38] sm:$0xff] %vm677_vm1, %v625_v46 }
  0xe7   : > { %v3313_v59 = vpop.f32.mrf.mxu2 }
  0xe9   : > { %v3315_v61 = vpop.f32.mrf.mxu3  ;;  %v632_v62 = vpop.f32.mrf.mxu1 }
  0xea   : > { %v548_v1 = vpop.f32.mrf.mxu0 }
  0xeb   : > { %v628_v3 = vadd.f32 %v627_v36, %v548_v1  ;;  %v2597_v36 = vor.u32 %v2889_v21, %v2594_v22  ;;  %v2608_v21 = vld [vmem:[%s3041_s16 + $0x70] sm:$0xf]  ;;  %v2894_v22 = vld [vmem:[%s3041_s16 + $0x74] sm:$0xf0] }
  0xec   : > { %1552 = vmatmul.bf16.gmra.mxu1 %v2585_v60  ;;  %1057 = vmatmul.bf16.gmra.mxu2 %v2451_v0  ;;  %v2601_v60 = vor.u32 %v2892_v51, %v2600_v50  ;;  %v2467_v0 = vor.u32 %v2868_v53, %v2466_v52  ;;  %v1164_v1 = vld [vmem:[#allocation2 + $0x38] sm:$0xff] }
  0xed   : > { %686 = vst.msk [vmem:[#allocation2 + $0x40] sm:$0xff] %vm677_vm1, %v628_v3  ;;  %587 = vmatmul.bf16.gmra.mxu0 %v2269_v63  ;;  %v2605_v3 = vor.u32 %v2891_v54, %v2602_v55 }
  0xee   : > { %2728 = vmatmul.msk.bf16.gmra.mxu3 %vm476_vm0, %v2589_v2 }
  0xef   : > { %v3319_v4 = vpop.f32.mrf.mxu2 }
  0xf1   : > { %v3321_v6 = vpop.f32.mrf.mxu3  ;;  %v634_v8 = vpop.f32.mrf.mxu1 }
  0xf2   : > { %v550_v11 = vpop.f32.mrf.mxu0 }
  0xf3   : > { %v630_v12 = vadd.f32 %v629_v44, %v550_v11  ;;  %v1163_v44 = vld [vmem:[#allocation2 + $0x30] sm:$0xff] }
  0xf4   : > { %v1165_v15 = vld [vmem:[#allocation2 + $0x40] sm:$0xff] }
  0xf5   : > { %687 = vst.msk [vmem:[#allocation2 + $0x48] sm:$0xff] %vm677_vm1, %v630_v12 }
  0xf7   : > { %v3332_v25 = vpop.f32.mrf.mxu2 }
  0xf9   : > { %v3334_v27 = vpop.f32.mrf.mxu3  ;;  %v637_v28 = vpop.f32.mrf.mxu1 }
  0xfa   : > { %v553_v32 = vpop.f32.mrf.mxu0 }
  0xfb   : > { %v633_v37 = vadd.f32 %v632_v62, %v553_v32 }
  0xfc   : > { %1557 = vmatmul.bf16.gmra.mxu1 %v2593_v26  ;;  %1062 = vmatmul.bf16.gmra.mxu2 %v2459_v30  ;;  %v2474_v26 = vld [vmem:[%s3041_s16 + $0xe0] sm:$0xf]  ;;  %v2610_v30 = vld [vmem:[%s3041_s16 + $0x78] sm:$0xf0] }
  0xfd   : > { %688 = vst.msk [vmem:[#allocation2 + $0x50] sm:$0xff] %vm677_vm1, %v633_v37  ;;  %592 = vmatmul.bf16.gmra.mxu0 %v2277_v29  ;;  %v2893_v29 = vld [vmem:[%s3041_s16 + $0x74] sm:$0xf] }
  0xfe   : > { %2729 = vmatmul.msk.bf16.gmra.mxu3 %vm476_vm0, %v2597_v36  ;;  %v2609_v36 = vor.u32 %v2894_v22, %v2608_v21 }
  0xff   : > { %v1023_v38 = vpop.f32.mrf.mxu2 }
 0x100   : > { %v1103_v39 = vadd.f32 %v3210_v10, %v1023_v38 }
 0x101   : > { %v3339_v40 = vpop.f32.mrf.mxu3  ;;  %v639_v41 = vpop.f32.mrf.mxu1 }
 0x102   : > { %v555_v45 = vpop.f32.mrf.mxu0  ;;  %v1191_v46 = vadd.f32 %v1163_v44, %v1103_v39  ;;  %v1166_v44 = vld [vmem:[#allocation2 + $0x48] sm:$0xff] }
 0x103   : > { %v635_v48 = vadd.f32 %v634_v8, %v555_v45  ;;  %v2613_v45 = vor.u32 %v2893_v29, %v2610_v30 }
 0x104   : > { %1219 = vst.msk [vmem:[#allocation2 + $0x30] sm:$0xff] %vm677_vm1, %v1191_v46  ;;  %v1167_v53 = vld [vmem:[#allocation2 + $0x50] sm:$0xff] }
 0x105   : > { %689 = vst.msk [vmem:[#allocation2 + $0x58] sm:$0xff] %vm677_vm1, %v635_v48 }
 0x107   : > { %v1025_v58 = vpop.f32.mrf.mxu2 }
 0x108   : > { %v1105_v10 = vadd.f32 %v3231_v24, %v1025_v58 }
 0x109   : > { %v3350_v62 = vpop.f32.mrf.mxu3  ;;  %v642_v63 = vpop.f32.mrf.mxu1 }
 0x10a   : > { %v558_v2 = vpop.f32.mrf.mxu0  ;;  %v1192_v8 = vadd.f32 %v1164_v1, %v1105_v10  ;;  %v2896_v10 = vld [vmem:[%s3041_s16 + $0x84] sm:$0xf0]  ;;  %v2895_v1 = vld [vmem:[%s3041_s16 + $0x84] sm:$0xf] }
 0x10b   : > { %v638_v11 = vadd.f32 %v637_v28, %v558_v2  ;;  %v2870_v28 = vld [vmem:[%s3041_s16 + $0xe4] sm:$0xf0]  ;;  %v2618_v2 = vld [vmem:[%s3041_s16 + $0x88] sm:$0xf0] }
 0x10c   : > { %1562 = vmatmul.bf16.gmra.mxu1 %v2601_v60  ;;  %1220 = vst.msk [vmem:[#allocation2 + $0x38] sm:$0xff] %vm677_vm1, %v1192_v8  ;;  %1067 = vmatmul.bf16.gmra.mxu2 %v2467_v0  ;;  %v2475_v39 = vor.u32 %v2870_v28, %v2474_v26  ;;  %v2616_v60 = vld [vmem:[%s3041_s16 + $0x80] sm:$0xf]  ;;  %v2372_v0 = vld [vmem:[%s3041_s16 + $0x18] sm:$0xf0] }
 0x10d   : > { %690 = vst.msk [vmem:[#allocation2 + $0x60] sm:$0xff] %vm677_vm1, %v638_v11  ;;  %v2617_v8 = vor.u32 %v2896_v10, %v2616_v60 }
 0x10e   : > { %2730 = vmatmul.msk.bf16.gmra.mxu3 %vm476_vm0, %v2605_v3 }
 0x10f   : > { %v1028_v24 = vpop.f32.mrf.mxu2 }
 0x110   : > { %v1108_v12 = vadd.f32 %v3244_v35, %v1028_v24 }
 0x111   : > { %v3356_v13 = vpop.f32.mrf.mxu3  ;;  %v644_v14 = vpop.f32.mrf.mxu1 }
 0x112   : > { %v560_v18 = vpop.f32.mrf.mxu0  ;;  %v1193_v19 = vadd.f32 %v1165_v15, %v1108_v12  ;;  %v1168_v15 = vld [vmem:[#allocation2 + $0x58] sm:$0xff] }
 0x113   : > { %v640_v20 = vadd.f32 %v639_v41, %v560_v18  ;;  %v2621_v18 = vor.u32 %v2895_v1, %v2618_v2 }
 0x114   : > { %1221 = vst.msk [vmem:[#allocation2 + $0x40] sm:$0xff] %vm677_vm1, %v1193_v19  ;;  %v1169_v28 = vld [vmem:[#allocation2 + $0x60] sm:$0xff] }
 0x115   : > { %691 = vst.msk [vmem:[#allocation2 + $0x68] sm:$0xff] %vm677_vm1, %v640_v20 }
 0x117   : > { %v1030_v32 = vpop.f32.mrf.mxu2 }
 0x118   : > { %v1110_v35 = vadd.f32 %v3257_v49, %v1030_v32 }
 0x119   : > { %v3367_v37 = vpop.f32.mrf.mxu3  ;;  %v647_v38 = vpop.f32.mrf.mxu1 }
 0x11a   : > { %v563_v41 = vpop.f32.mrf.mxu0  ;;  %v1194_v46 = vadd.f32 %v1166_v44, %v1110_v35  ;;  %v2898_v35 = vld [vmem:[%s3041_s16 + $0x94] sm:$0xf0]  ;;  %v2897_v44 = vld [vmem:[%s3041_s16 + $0x94] sm:$0xf] }
 0x11b   : > { %v643_v48 = vadd.f32 %v642_v63, %v563_v41  ;;  %v2843_v63 = vld [vmem:[%s3041_s16 + $0x14] sm:$0xf]  ;;  %v2626_v41 = vld [vmem:[%s3041_s16 + $0x98] sm:$0xf0] }
 0x11c   : > { %1567 = vmatmul.bf16.gmra.mxu1 %v2609_v36  ;;  %1222 = vst.msk [vmem:[#allocation2 + $0x48] sm:$0xff] %vm677_vm1, %v1194_v46  ;;  %1072 = vmatmul.bf16.gmra.mxu2 %v2475_v39  ;;  %v2375_v12 = vor.u32 %v2843_v63, %v2372_v0  ;;  %v2624_v36 = vld [vmem:[%s3041_s16 + $0x90] sm:$0xf]  ;;  %v2380_v39 = vld [vmem:[%s3041_s16 + $0x28] sm:$0xf0] }
 0x11d   : > { %692 = vst.msk [vmem:[#allocation2 + $0x70] sm:$0xff] %vm677_vm1, %v643_v48  ;;  %v2625_v46 = vor.u32 %v2898_v35, %v2624_v36 }
 0x11e   : > { %2731 = vmatmul.msk.bf16.gmra.mxu3 %vm476_vm0, %v2613_v45 }
 0x11f   : > { %v1033_v49 = vpop.f32.mrf.mxu2 }
 0x120   : > { %v1113_v50 = vadd.f32 %v3264_v57, %v1033_v49 }
 0x121   : > { %v3373_v51 = vpop.f32.mrf.mxu3  ;;  %v649_v52 = vpop.f32.mrf.mxu1 }
 0x122   : > { %v565_v54 = vpop.f32.mrf.mxu0  ;;  %v1195_v55 = vadd.f32 %v1167_v53, %v1113_v50  ;;  %v1170_v53 = vld [vmem:[#allocation2 + $0x68] sm:$0xff] }
 0x123   : > { %v645_v58 = vadd.f32 %v644_v14, %v565_v54  ;;  %v2629_v54 = vor.u32 %v2897_v44, %v2626_v41 }
 0x124   : > { %1223 = vst.msk [vmem:[#allocation2 + $0x50] sm:$0xff] %vm677_vm1, %v1195_v55  ;;  %v1171_v0 = vld [vmem:[#allocation2 + $0x70] sm:$0xff] }
 0x125   : > { %693 = vst.msk [vmem:[#allocation2 + $0x78] sm:$0xff] %vm677_vm1, %v645_v58 }
 0x127   : > { %v1035_v3 = vpop.f32.mrf.mxu2 }
 0x128   : > { %v1115_v57 = vadd.f32 %v3277_v7, %v1035_v3 }
 0x129   : > { %v3384_v11 = vpop.f32.mrf.mxu3  ;;  %v652_v24 = vpop.f32.mrf.mxu1 }
 0x12a   : > { %v568_v14 = vpop.f32.mrf.mxu0  ;;  %v1196_v19 = vadd.f32 %v1168_v15, %v1115_v57  ;;  %v2900_v57 = vld [vmem:[%s3041_s16 + $0xa4] sm:$0xf0]  ;;  %v2899_v15 = vld [vmem:[%s3041_s16 + $0xa4] sm:$0xf] }
 0x12b   : > { %v648_v20 = vadd.f32 %v647_v38, %v568_v14  ;;  %v2845_v38 = vld [vmem:[%s3041_s16 + $0x24] sm:$0xf]  ;;  %v2634_v14 = vld [vmem:[%s3041_s16 + $0xa8] sm:$0xf0] }
 0x12c   : > { %1572 = vmatmul.bf16.gmra.mxu1 %v2617_v8  ;;  %1224 = vst.msk [vmem:[#allocation2 + $0x58] sm:$0xff] %vm677_vm1, %v1196_v19  ;;  %2528 = vmatmul.msk.bf16.vlgmr.msra.gmra.mxu2 %vm476_vm0, %v2375_v12  ;;  %v2383_v50 = vor.u32 %v2845_v38, %v2380_v39  ;;  %v2632_v8 = vld [vmem:[%s3041_s16 + $0xa0] sm:$0xf]  ;;  %v2388_v12 = vld [vmem:[%s3041_s16 + $0x38] sm:$0xf0] }
 0x12d   : > { %694 = vst.msk [vmem:[#allocation2 + $0x80] sm:$0xff] %vm677_vm1, %v648_v20  ;;  %v2633_v19 = vor.u32 %v2900_v57, %v2632_v8 }
 0x12e   : > { %2732 = vmatmul.msk.bf16.gmra.mxu3 %vm476_vm0, %v2621_v18 }
 0x12f   : > { %v1038_v7 = vpop.f32.mrf.mxu2 }
 0x130   : > { %v1118_v21 = vadd.f32 %v3283_v17, %v1038_v7 }
 0x131   : > { %v3391_v22 = vpop.f32.mrf.mxu3  ;;  %v654_v26 = vpop.f32.mrf.mxu1 }
 0x132   : > { %v570_v29 = vpop.f32.mrf.mxu0  ;;  %v1197_v30 = vadd.f32 %v1169_v28, %v1118_v21  ;;  %v1172_v28 = vld [vmem:[#allocation2 + $0x78] sm:$0xff] }
 0x133   : > { %v650_v32 = vadd.f32 %v649_v52, %v570_v29  ;;  %v2637_v29 = vor.u32 %v2899_v15, %v2634_v14 }
 0x134   : > { %1225 = vst.msk [vmem:[#allocation2 + $0x60] sm:$0xff] %vm677_vm1, %v1197_v30  ;;  %v1173_v39 = vld [vmem:[#allocation2 + $0x80] sm:$0xff] }
 0x135   : > { %695 = vst.msk [vmem:[#allocation2 + $0x88] sm:$0xff] %vm677_vm1, %v650_v32 }
 0x137   : > { %v1040_v45 = vpop.f32.mrf.mxu2 }
 0x138   : > { %v1120_v17 = vadd.f32 %v3296_v33, %v1040_v45 }
 0x139   : > { %v3402_v48 = vpop.f32.mrf.mxu3  ;;  %v657_v49 = vpop.f32.mrf.mxu1 }
 0x13a   : > { %v573_v52 = vpop.f32.mrf.mxu0  ;;  %v1198_v55 = vadd.f32 %v1170_v53, %v1120_v17  ;;  %v2640_v17 = vld [vmem:[%s3041_s16 + $0xb0] sm:$0xf]  ;;  %v2642_v53 = vld [vmem:[%s3041_s16 + $0xb8] sm:$0xf0] }
 0x13b   : > { %v653_v58 = vadd.f32 %v652_v24, %v573_v52  ;;  %v2847_v24 = vld [vmem:[%s3041_s16 + $0x34] sm:$0xf] }
 0x13c   : > { %1577 = vmatmul.bf16.gmra.mxu1 %v2625_v46  ;;  %1226 = vst.msk [vmem:[#allocation2 + $0x68] sm:$0xff] %vm677_vm1, %v1198_v55  ;;  %2529 = vmatmul.msk.bf16.gmra.mxu2 %vm476_vm0, %v2383_v50  ;;  %v2391_v21 = vor.u32 %v2847_v24, %v2388_v12  ;;  %v2901_v50 = vld [vmem:[%s3041_s16 + $0xb4] sm:$0xf] }
 0x13d   : > { %696 = vst.msk [vmem:[#allocation2 + $0x90] sm:$0xff] %vm677_vm1, %v653_v58 }
 0x13e   : > { %2733 = vmatmul.msk.bf16.gmra.mxu3 %vm476_vm0, %v2629_v54 }
 0x13f   : > { %v1043_v33 = vpop.f32.mrf.mxu2 }
 0x140   : > { %v1123_v60 = vadd.f32 %v3302_v43, %v1043_v33  ;;  %v1174_v33 = vld [vmem:[#allocation2 + $0x88] sm:$0xff] }
 0x141   : > { %v3409_v10 = vpop.f32.mrf.mxu3  ;;  %v659_v63 = vpop.f32.mrf.mxu1 }
 0x142   : > { %v575_v1 = vpop.f32.mrf.mxu0  ;;  %v1199_v2 = vadd.f32 %v1171_v0, %v1123_v60 }
 0x143   : > { %v655_v3 = vadd.f32 %v654_v26, %v575_v1  ;;  %v2645_v1 = vor.u32 %v2901_v50, %v2642_v53  ;;  %v2656_v50 = vld [vmem:[%s3041_s16 + $0xd0] sm:$0xf]  ;;  %v2906_v53 = vld [vmem:[%s3041_s16 + $0xd4] sm:$0xf0] }
 0x144   : > { %1227 = vst.msk [vmem:[#allocation2 + $0x70] sm:$0xff] %vm677_vm1, %v1199_v2  ;;  %v1175_v24 = vld [vmem:[#allocation2 + $0x90] sm:$0xff] }
 0x145   : > { %697 = vst.msk [vmem:[#allocation2 + $0x98] sm:$0xff] %vm677_vm1, %v655_v3 }
 0x147   : > { %v1045_v18 = vpop.f32.mrf.mxu2 }
 0x148   : > { %v1125_v43 = vadd.f32 %v3315_v61, %v1045_v18  ;;  %v2648_v18 = vld [vmem:[%s3041_s16 + $0xc0] sm:$0xf] }
 0x149   : > { %v3420_v20 = vpop.f32.mrf.mxu3  ;;  %v1543_v7 = vpop.f32.mrf.mxu1 }
 0x14a   : > { %v578_v26 = vpop.f32.mrf.mxu0  ;;  %v1200_v30 = vadd.f32 %v1172_v28, %v1125_v43  ;;  %v2903_v43 = vld [vmem:[%s3041_s16 + $0xc4] sm:$0xf] }
 0x14b   : > { %v658_v32 = vadd.f32 %v657_v49, %v578_v26  ;;  %v2902_v49 = vld [vmem:[%s3041_s16 + $0xb4] sm:$0xf0] }
 0x14c   : > { %1582 = vmatmul.bf16.gmra.mxu1 %v2633_v19  ;;  %1228 = vst.msk [vmem:[#allocation2 + $0x78] sm:$0xff] %vm677_vm1, %v1200_v30  ;;  %2530 = vmatmul.msk.bf16.gmra.mxu2 %vm476_vm0, %v2391_v21  ;;  %v2641_v54 = vor.u32 %v2902_v49, %v2640_v17  ;;  %v2904_v19 = vld [vmem:[%s3041_s16 + $0xc4] sm:$0xf0]  ;;  %v1176_v30 = vld [vmem:[#allocation2 + $0x98] sm:$0xff] }
 0x14d   : > { %698 = vst.msk [vmem:[#allocation2 + $0xa0] sm:$0xff] %vm677_vm1, %v658_v32  ;;  %v2649_v28 = vor.u32 %v2904_v19, %v2648_v18 }
 0x14e   : > { %2734 = vmatmul.msk.bf16.gmra.mxu3 %vm476_vm0, %v2637_v29 }
 0x14f   : > { %v1048_v61 = vpop.f32.mrf.mxu2 }
 0x150   : > { %v1128_v36 = vadd.f32 %v3321_v6, %v1048_v61 }
 0x151   : > { %v1622_v35 = vpop.f32.mrf.mxu3  ;;  %v1545_v38 = vpop.f32.mrf.mxu1 }
 0x152   : > { %v3427_v44 = vadd.f32 %v1622_v35, %v1543_v7  ;;  %v580_v41 = vpop.f32.mrf.mxu0  ;;  %v1201_v45 = vadd.f32 %v1173_v39, %v1128_v36  ;;  %v2650_v7 = vld [vmem:[%s3041_s16 + $0xc8] sm:$0xf0] }
 0x153   : > { %v660_v46 = vadd.f32 %v659_v63, %v580_v41  ;;  %v2653_v36 = vor.u32 %v2903_v43, %v2650_v7  ;;  %v2664_v43 = vld [vmem:[%s3041_s16 + $0xe0] sm:$0xf]  ;;  %v2908_v7 = vld [vmem:[%s3041_s16 + $0xe4] sm:$0xf0] }
 0x154   : > { %1229 = vst.msk [vmem:[#allocation2 + $0x80] sm:$0xff] %vm677_vm1, %v1201_v45  ;;  %v1177_v45 = vld [vmem:[#allocation2 + $0xa0] sm:$0xff] }
 0x155   : > { %699 = vst.msk [vmem:[#allocation2 + $0xa8] sm:$0xff] %vm677_vm1, %v660_v46 }
 0x157   : > { %v1050_v52 = vpop.f32.mrf.mxu2 }
 0x158   : > { %v1130_v6 = vadd.f32 %v3334_v27, %v1050_v52  ;;  %v2905_v52 = vld [vmem:[%s3041_s16 + $0xd4] sm:$0xf] }
 0x159   : > { %v1624_v55 = vpop.f32.mrf.mxu3  ;;  %v1548_v58 = vpop.f32.mrf.mxu1 }
 0x15a   : > { %v3436_v60 = vadd.f32 %v1624_v55, %v1545_v38  ;;  %v583_v0 = vpop.f32.mrf.mxu0  ;;  %v1202_v63 = vadd.f32 %v1174_v33, %v1130_v6  ;;  %v2657_v55 = vor.u32 %v2906_v53, %v2656_v50  ;;  %v2672_v53 = vld [vmem:[%s3041_s16 + $0xf0] sm:$0xf] }
 0x15b   : > { %v663_v2 = vadd.f32 %v3208_v9, %v583_v0 }
 0x15c   : > { %1587 = vmatmul.bf16.gmra.mxu1 %v2641_v54  ;;  %1230 = vst.msk [vmem:[#allocation2 + $0x88] sm:$0xff] %vm677_vm1, %v1202_v63  ;;  %v2658_v54 = vld [vmem:[%s3041_s16 + $0xd8] sm:$0xf0]  ;;  %v1178_v0 = vld [vmem:[#allocation2 + $0xa8] sm:$0xff] }
 0x15d   : > { %700 = vst.msk [vmem:[#allocation2 + $0xb0] sm:$0xff] %vm677_vm1, %v663_v2  ;;  %v2661_v2 = vor.u32 %v2905_v52, %v2658_v54  ;;  %v2910_v52 = vld [vmem:[%s3041_s16 + $0xf4] sm:$0xf0]  ;;  %v2909_v54 = vld [vmem:[%s3041_s16 + $0xf4] sm:$0xf] }
 0x15e   : > { %2735 = vmatmul.msk.bf16.gmra.mxu3 %vm476_vm0, %v2645_v1 }
 0x15f   : > { %v1053_v27 = vpop.f32.mrf.mxu2 }
 0x160   : > { %v1133_v3 = vadd.f32 %v3339_v40, %v1053_v27 }
 0x161   : > { %v1627_v8 = vpop.f32.mrf.mxu3  ;;  %v1550_v57 = vpop.f32.mrf.mxu1 }
 0x162   : > { %v3443_v12 = vadd.f32 %v1627_v8, %v1548_v58  ;;  %v585_v15 = vpop.f32.mrf.mxu0  ;;  %v1203_v9 = vadd.f32 %v1175_v24, %v1133_v3 }
 0x163   : > { %v665_v14 = vadd.f32 %v3229_v23, %v585_v15 }
 0x164   : > { %1231 = vst.msk [vmem:[#allocation2 + $0x90] sm:$0xff] %vm677_vm1, %v1203_v9  ;;  %v1179_v24 = vld [vmem:[#allocation2 + $0xb0] sm:$0xff] }
 0x165   : > { %701 = vst.msk [vmem:[#allocation2 + $0xb8] sm:$0xff] %vm677_vm1, %v665_v14  ;;  %v1698_v14 = vld [vmem:[#allocation2 + $0x30] sm:$0xff] }
 0x167   : > { %v1055_v21 = vpop.f32.mrf.mxu2 }
 0x168   : > { %v1135_v40 = vadd.f32 %v3350_v62, %v1055_v21  ;;  %v2666_v21 = vld [vmem:[%s3041_s16 + $0xe8] sm:$0xf0] }
 0x169   : > { %v1629_v26 = vpop.f32.mrf.mxu3  ;;  %v1553_v29 = vpop.f32.mrf.mxu1 }
 0x16a   : > { %v3453_v32 = vadd.f32 %v1629_v26, %v1550_v57  ;;  %v588_v61 = vpop.f32.mrf.mxu0  ;;  %v1204_v23 = vadd.f32 %v1176_v30, %v1135_v40  ;;  %v2665_v40 = vor.u32 %v2908_v7, %v2664_v43 }
 0x16b   : > { %v668_v35 = vadd.f32 %v3242_v34, %v588_v61 }
 0x16c   : > { %1592 = vmatmul.bf16.gmra.mxu1 %v2649_v28  ;;  %1232 = vst.msk [vmem:[#allocation2 + $0x98] sm:$0xff] %vm677_vm1, %v1204_v23  ;;  %v1180_v61 = vld [vmem:[#allocation2 + $0xb8] sm:$0xff] }
 0x16d   : > { %702 = vst.msk [vmem:[#allocation2 + $0xc0] sm:$0xff] %vm677_vm1, %v668_v35  ;;  %v1699_v35 = vld [vmem:[#allocation2 + $0x38] sm:$0xff] }
 0x16e   : > { %2736 = vmatmul.msk.bf16.gmra.mxu3 %vm476_vm0, %v2653_v36 }
 0x16f   : > { %v1058_v62 = vpop.f32.mrf.mxu2 }
 0x170   : > { %v1138_v38 = vadd.f32 %v3356_v13, %v1058_v62 }
 0x171   : > { %v1632_v39 = vpop.f32.mrf.mxu3  ;;  %v1555_v41 = vpop.f32.mrf.mxu1 }
 0x172   : > { %v3460_v46 = vadd.f32 %v1632_v39, %v1553_v29  ;;  %v590_v17 = vpop.f32.mrf.mxu0  ;;  %v1205_v34 = vadd.f32 %v1177_v45, %v1138_v38 }
 0x173   : > { %v670_v49 = vadd.f32 %v3255_v47, %v590_v17 }
 0x174   : > { %1233 = vst.msk [vmem:[#allocation2 + $0xa0] sm:$0xff] %vm677_vm1, %v1205_v34  ;;  %v1181_v45 = vld [vmem:[#allocation2 + $0xc0] sm:$0xff] }
 0x175   : > { %703 = vst.msk [vmem:[#allocation2 + $0xc8] sm:$0xff] %vm677_vm1, %v670_v49  ;;  %v1700_v49 = vld [vmem:[#allocation2 + $0x40] sm:$0xff] }
 0x177   : > { %v1060_v6 = vpop.f32.mrf.mxu2 }
 0x178   : > { %v1140_v13 = vadd.f32 %v3367_v37, %v1060_v6  ;;  %v2674_v6 = vld [vmem:[%s3041_s16 + $0xf8] sm:$0xf0] }
 0x179   : > { %v1634_v58 = vpop.f32.mrf.mxu3  ;;  %v1558_v33 = vpop.f32.mrf.mxu1 }
 0x17a   : > { %v3470_v1 = vadd.f32 %v1634_v58, %v1555_v41  ;;  %v593_v63 = vpop.f32.mrf.mxu0  ;;  %v1206_v47 = vadd.f32 %v1178_v0, %v1140_v13  ;;  %v2673_v13 = vor.u32 %v2910_v52, %v2672_v53 }
 0x17b   : > { %v673_v27 = vadd.f32 %v3262_v56, %v593_v63 }
 0x17c   : > { %1597 = vmatmul.bf16.gmra.mxu1 %v2657_v55  ;;  %1234 = vst.msk [vmem:[#allocation2 + $0xa8] sm:$0xff] %vm677_vm1, %v1206_v47  ;;  %v1182_v0 = vld [vmem:[#allocation2 + $0xc8] sm:$0xff] }
 0x17d   : > { %704 = vst.msk [vmem:[#allocation2 + $0xd0] sm:$0xff] %vm677_vm1, %v673_v27  ;;  %v1701_v27 = vld [vmem:[#allocation2 + $0x48] sm:$0xff] }
 0x17e   : > { %2737 = vmatmul.msk.bf16.gmra.mxu3 %vm476_vm0, %v2661_v2  ;;  %v2677_v2 = vor.u32 %v2909_v54, %v2674_v6  ;;  %v1159_v6 = vld [vmem:[#allocation2 + $0x10] sm:$0xff] }
 0x17f   : > { %v1063_v37 = vpop.f32.mrf.mxu2 }
 0x180   : > { %v1143_v3 = vadd.f32 %v3373_v51, %v1063_v37  ;;  %v2907_v51 = vld [vmem:[%s3041_s16 + $0xe4] sm:$0xf] }
 0x181   : > { %v1637_v8 = vpop.f32.mrf.mxu3  ;;  %v1560_v57 = vpop.f32.mrf.mxu1 }
 0x182   : > { %v1638_v15 = vadd.f32 %v1637_v8, %v1558_v33  ;;  %v595_v9 = vpop.f32.mrf.mxu0  ;;  %v1207_v56 = vadd.f32 %v1179_v24, %v1143_v3 }
 0x183   : > { %v675_v18 = vadd.f32 %v3275_v5, %v595_v9  ;;  %v2669_v5 = vor.u32 %v2907_v51, %v2666_v21 }
 0x184   : > { %v1726_v19 = vadd.f32 %v1698_v14, %v1638_v15  ;;  %1235 = vst.msk [vmem:[#allocation2 + $0xb0] sm:$0xff] %vm677_vm1, %v1207_v56  ;;  %v1183_v24 = vld [vmem:[#allocation2 + $0xd0] sm:$0xff] }
 0x185   : > { %705 = vst.msk [vmem:[#allocation2 + $0xd8] sm:$0xff] %vm677_vm1, %v675_v18  ;;  %v1702_v56 = vld [vmem:[#allocation2 + $0x50] sm:$0xff] }
 0x186   : > { %1754 = vst.msk [vmem:[#allocation2 + $0x30] sm:$0xff] %vm677_vm1, %v1726_v19 }
 0x187   : > { %v1065_v28 = vpop.f32.mrf.mxu2 }
 0x188   : > { %v1145_v26 = vadd.f32 %v3384_v11, %v1065_v28 }
 0x189   : > { %v1639_v29 = vpop.f32.mrf.mxu3  ;;  %v1563_v30 = vpop.f32.mrf.mxu1 }
 0x18a   : > { %v1640_v36 = vadd.f32 %v1639_v29, %v1560_v57  ;;  %v1208_v23 = vadd.f32 %v1180_v61, %v1145_v26 }
 0x18c   : > { %v1727_v62 = vadd.f32 %v1699_v35, %v1640_v36  ;;  %1602 = vmatmul.bf16.gmra.mxu1 %v2665_v40  ;;  %1236 = vst.msk [vmem:[#allocation2 + $0xb8] sm:$0xff] %vm677_vm1, %v1208_v23  ;;  %v1184_v51 = vld [vmem:[#allocation2 + $0xd8] sm:$0xff]  ;;  %v1157_v36 = vld [vmem:[#allocation2] sm:$0xff] }
 0x18e   : > { %1755 = vst.msk [vmem:[#allocation2 + $0x38] sm:$0xff] %vm677_vm1, %v1727_v62  ;;  %2738 = vmatmul.msk.bf16.gmra.mxu3 %vm476_vm0, %v2669_v5 }
 0x18f   : > { %v1068_v11 = vpop.f32.mrf.mxu2 }
 0x190   : > { %v1148_v38 = vadd.f32 %v3391_v22, %v1068_v11 }
 0x191   : > { %v1642_v39 = vpop.f32.mrf.mxu3  ;;  %v1565_v41 = vpop.f32.mrf.mxu1 }
 0x192   : > { %v1643_v17 = vadd.f32 %v1642_v39, %v1563_v30  ;;  %v1209_v34 = vadd.f32 %v1181_v45, %v1148_v38 }
 0x194   : > { %v1728_v50 = vadd.f32 %v1700_v49, %v1643_v17  ;;  %1237 = vst.msk [vmem:[#allocation2 + $0xc0] sm:$0xff] %vm677_vm1, %v1209_v34 }
 0x196   : > { %1756 = vst.msk [vmem:[#allocation2 + $0x40] sm:$0xff] %vm677_vm1, %v1728_v50 }
 0x197   : > { %v1070_v55 = vpop.f32.mrf.mxu2 }
 0x198   : > { %v1150_v58 = vadd.f32 %v3402_v48, %v1070_v55 }
 0x199   : > { %v1644_v22 = vpop.f32.mrf.mxu3  ;;  %v1568_v33 = vpop.f32.mrf.mxu1 }
 0x19a   : > { %v1645_v63 = vadd.f32 %v1644_v22, %v1565_v41  ;;  %v1210_v47 = vadd.f32 %v1182_v0, %v1150_v58  ;;  %v1158_v41 = vld [vmem:[#allocation2 + $0x8] sm:$0xff]  ;;  %v1706_v58 = vld [vmem:[#allocation2 + $0x70] sm:$0xff] }
 0x19c   : > { %v1729_v37 = vadd.f32 %v1701_v27, %v1645_v63  ;;  %1607 = vmatmul.bf16.gmra.mxu1 %v2673_v13  ;;  %1238 = vst.msk [vmem:[#allocation2 + $0xc8] sm:$0xff] %vm677_vm1, %v1210_v47  ;;  %v1160_v47 = vld [vmem:[#allocation2 + $0x18] sm:$0xff] }
 0x19e   : > { %1757 = vst.msk [vmem:[#allocation2 + $0x48] sm:$0xff] %vm677_vm1, %v1729_v37  ;;  %2739 = vmatmul.msk.bf16.gmra.mxu3 %vm476_vm0, %v2677_v2 }
 0x19f   : > { %v1073_v3 = vpop.f32.mrf.mxu2 }
 0x1a0   : > { %v1153_v8 = vadd.f32 %v3409_v10, %v1073_v3  ;;  %v1703_v10 = vld [vmem:[#allocation2 + $0x58] sm:$0xff] }
 0x1a1   : > { %v1647_v57 = vpop.f32.mrf.mxu3  ;;  %v1570_v48 = vpop.f32.mrf.mxu1  ;;  %v1707_v3 = vld [vmem:[#allocation2 + $0x78] sm:$0xff] }
 0x1a2   : > { %v1648_v15 = vadd.f32 %v1647_v57, %v1568_v33  ;;  %v1211_v9 = vadd.f32 %v1183_v24, %v1153_v8 }
 0x1a4   : > { %v1730_v14 = vadd.f32 %v1702_v56, %v1648_v15  ;;  %1239 = vst.msk [vmem:[#allocation2 + $0xd0] sm:$0xff] %vm677_vm1, %v1211_v9  ;;  %v1161_v56 = vld [vmem:[#allocation2 + $0x20] sm:$0xff] }
 0x1a6   : > { %1758 = vst.msk [vmem:[#allocation2 + $0x50] sm:$0xff] %vm677_vm1, %v1730_v14 }
 0x1a7   : > { %v1075_v18 = vpop.f32.mrf.mxu2 }
 0x1a8   : > { %v1155_v19 = vadd.f32 %v3420_v20, %v1075_v18  ;;  %v1704_v20 = vld [vmem:[#allocation2 + $0x60] sm:$0xff] }
 0x1a9   : > { %v1649_v43 = vpop.f32.mrf.mxu3  ;;  %v1573_v7 = vpop.f32.mrf.mxu1  ;;  %v3528_v18 = vld [vmem:[%s3662_s2] ss:$0 sm:$0xff] }
 0x1aa   : > { %v1650_v21 = vadd.f32 %v1649_v43, %v1570_v48  ;;  %v1212_v28 = vadd.f32 %v1184_v51, %v1155_v19  ;;  %v1708_v19 = vld [vmem:[#allocation2 + $0x80] sm:$0xff] }
 0x1ac   : > { %v1731_v40 = vadd.f32 %v1703_v10, %v1650_v21  ;;  %1240 = vst.msk [vmem:[#allocation2 + $0xd8] sm:$0xff] %vm677_vm1, %v1212_v28 }
 0x1ae   : > { %1759 = vst.msk [vmem:[#allocation2 + $0x58] sm:$0xff] %vm677_vm1, %v1731_v40 }
 0x1af   : > { %v1087_v26 = vpop.f32.mrf.mxu2 }
 0x1b0   : > { %v1088_v29 = vadd.f32 %v1087_v26, %v3281_v16  ;;  %v1705_v16 = vld [vmem:[#allocation2 + $0x68] sm:$0xff] }
 0x1b1   : > { %v1652_v30 = vpop.f32.mrf.mxu3  ;;  %v1575_v61 = vpop.f32.mrf.mxu1 }
 0x1b2   : > { %v1653_v5 = vadd.f32 %v1652_v30, %v1573_v7  ;;  %v1185_v23 = vadd.f32 %v1157_v36, %v1088_v29 }
 0x1b4   : > { %v1732_v35 = vadd.f32 %v1704_v20, %v1653_v5  ;;  %1213 = vst.msk [vmem:[#allocation2] sm:$0xff] %vm677_vm1, %v1185_v23 }
 0x1b5   : > { %v1787_v29 = vld [vmem:[#allocation2 + $0x58] sm:$0xff] }
 0x1b6   : > { %1760 = vst.msk [vmem:[#allocation2 + $0x60] sm:$0xff] %vm677_vm1, %v1732_v35  ;;  %v1786_v35 = vld [vmem:[#allocation2 + $0x50] sm:$0xff] }
 0x1b7   : > { %v1089_v62 = vpop.f32.mrf.mxu2 }
 0x1b8   : > { %v1090_v11 = vadd.f32 %v1089_v62, %v3294_v31  ;;  %v1162_v62 = vld [vmem:[#allocation2 + $0x28] sm:$0xff] }
 0x1b9   : > { %v1654_v38 = vpop.f32.mrf.mxu3  ;;  %v1578_v39 = vpop.f32.mrf.mxu1 }
 0x1ba   : > { %v1655_v45 = vadd.f32 %v1654_v38, %v1575_v61  ;;  %v1186_v17 = vadd.f32 %v1158_v41, %v1090_v11  ;;  %v1819_v41 = vadd.f32 %v3528_v18, %v1787_v29 }
 0x1bb   : > { %v1692_v34 = vld [vmem:[#allocation2] sm:$0xff] }
 0x1bc   : > { %v1733_v49 = vadd.f32 %v1705_v16, %v1655_v45  ;;  %v1720_v50 = vadd.f32 %v1692_v34, %v3427_v44  ;;  %1214 = vst.msk [vmem:[#allocation2 + $0x8] sm:$0xff] %vm677_vm1, %v1186_v17  ;;  %v1709_v17 = vld [vmem:[#allocation2 + $0x88] sm:$0xff] }
 0x1bd   : > { %v1788_v10 = vld [vmem:[#allocation2 + $0x60] sm:$0xff]  ;;  %v1785_v16 = vld [vmem:[#allocation2 + $0x48] sm:$0xff] }
 0x1be   : > { %1761 = vst.msk [vmem:[#allocation2 + $0x68] sm:$0xff] %vm677_vm1, %v1733_v49  ;;  %v1820_v5 = vadd.f32 %v3528_v18, %v1788_v10 }
 0x1bf   : > { %1748 = vst.msk [vmem:[#allocation2] sm:$0xff] %vm677_vm1, %v1720_v50  ;;  %v1092_v53 = vpop.f32.mrf.mxu2 }
 0x1c0   : > { %v1093_v52 = vadd.f32 %v1092_v53, %v3300_v42  ;;  %v1848_v50 = vmax.f32 %v1820_v5, 0.0  ;;  %v1818_v53 = vadd.f32 %v3528_v18, %v1786_v35 }
 0x1c1   : > { %v1657_v31 = vpop.f32.mrf.mxu3  ;;  %v1580_v54 = vpop.f32.mrf.mxu1 }
 0x1c2   : > { %v1658_v55 = vadd.f32 %v1657_v31, %v1578_v39  ;;  %v1187_v13 = vadd.f32 %v1159_v6, %v1093_v52  ;;  %v1784_v52 = vld [vmem:[#allocation2 + $0x40] sm:$0xff]  ;;  %v1817_v6 = vadd.f32 %v3528_v18, %v1785_v16  ;;  %v1713_v16 = vld [vmem:[#allocation2 + $0xa8] sm:$0xff] }
 0x1c3   : > { %v1693_v22 = vld [vmem:[#allocation2 + $0x8] sm:$0xff] }
 0x1c4   : > { %v1734_v33 = vadd.f32 %v1706_v58, %v1658_v55  ;;  %v1721_v0 = vadd.f32 %v1693_v22, %v3436_v60  ;;  %1215 = vst.msk [vmem:[#allocation2 + $0x10] sm:$0xff] %vm677_vm1, %v1187_v13  ;;  %v1783_v55 = vld [vmem:[#allocation2 + $0x38] sm:$0xff]  ;;  %v1846_v13 = vmax.f32 %v1818_v53, 0.0  ;;  %v1816_v58 = vadd.f32 %v3528_v18, %v1784_v52  ;;  %v1714_v52 = vld [vmem:[#allocation2 + $0xb0] sm:$0xff] }
 0x1c5   : > { %v1789_v43 = vld [vmem:[#allocation2 + $0x68] sm:$0xff] }
 0x1c6   : > { %1762 = vst.msk [vmem:[#allocation2 + $0x70] sm:$0xff] %vm677_vm1, %v1734_v33  ;;  %v1821_v26 = vadd.f32 %v3528_v18, %v1789_v43 }
 0x1c7   : > { %1749 = vst.msk [vmem:[#allocation2 + $0x8] sm:$0xff] %vm677_vm1, %v1721_v0  ;;  %v1094_v44 = vpop.f32.mrf.mxu2  ;;  %v1782_v0 = vld [vmem:[#allocation2 + $0x30] sm:$0xff] }
 0x1c8   : > { %v1095_v63 = vadd.f32 %v1094_v44, %v3313_v59  ;;  %v1849_v39 = vmax.f32 %v1821_v26, 0.0 }
 0x1c9   : > { %v1659_v42 = vpop.f32.mrf.mxu3  ;;  %v1583_v2 = vpop.f32.mrf.mxu1 }
 0x1ca   : > { %v1660_v27 = vadd.f32 %v1659_v42, %v1580_v54  ;;  %v1188_v37 = vadd.f32 %v1160_v47, %v1095_v63  ;;  %v1870_v31 = vpack.c.bf16 %v1849_v39, %v1848_v50  ;;  %v1847_v54 = vmax.f32 %v1819_v41, 0.0 }
 0x1cb   : > { %v1694_v8 = vld [vmem:[#allocation2 + $0x10] sm:$0xff]  ;;  %v1845_v63 = vmax.f32 %v1817_v6, 0.0  ;;  %v1815_v42 = vadd.f32 %v3528_v18, %v1783_v55  ;;  %v1715_v55 = vld [vmem:[#allocation2 + $0xb8] sm:$0xff] }
 0x1cc   : > { %v1735_v57 = vadd.f32 %v1707_v3, %v1660_v27  ;;  %v1722_v48 = vadd.f32 %v1694_v8, %v3443_v12  ;;  %1216 = vst.msk [vmem:[#allocation2 + $0x18] sm:$0xff] %vm677_vm1, %v1188_v37  ;;  %v1869_v44 = vpack.c.bf16 %v1847_v54, %v1846_v13  ;;  %v1844_v37 = vmax.f32 %v1816_v58, 0.0 }
 0x1cd   : > { %v1790_v9 = vld [vmem:[#allocation2 + $0x70] sm:$0xff]  ;;  %v1814_v3 = vadd.f32 %v3528_v18, %v1782_v0  ;;  %v1716_v0 = vld [vmem:[#allocation2 + $0xc0] sm:$0xff] }
 0x1ce   : > { %1763 = vst.msk [vmem:[#allocation2 + $0x78] sm:$0xff] %vm677_vm1, %v1735_v57  ;;  %v1822_v21 = vadd.f32 %v3528_v18, %v1790_v9  ;;  %v1868_v57 = vpack.c.bf16 %v1845_v63, %v1844_v37 }
 0x1cf   : > { %1750 = vst.msk [vmem:[#allocation2 + $0x10] sm:$0xff] %vm677_vm1, %v1722_v48  ;;  %v1097_v60 = vpop.f32.mrf.mxu2  ;;  %v1843_v48 = vmax.f32 %v1815_v42, 0.0 }
 0x1d0   : > { %v1098_v24 = vadd.f32 %v1097_v60, %v3319_v4  ;;  %v1850_v61 = vmax.f32 %v1822_v21, 0.0  ;;  %v1842_v60 = vmax.f32 %v1814_v3, 0.0 }
 0x1d1   : > { %v1662_v59 = vpop.f32.mrf.mxu3  ;;  %v1585_v15 = vpop.f32.mrf.mxu1 }
 0x1d2   : > { %v1663_v14 = vadd.f32 %v1662_v59, %v1583_v2  ;;  %v1189_v12 = vadd.f32 %v1161_v56, %v1098_v24  ;;  %v1710_v2 = vld [vmem:[#allocation2 + $0x90] sm:$0xff]  ;;  %v1867_v9 = vpack.c.bf16 %v1843_v48, %v1842_v60 }
 0x1d3   : > { %v1695_v7 = vld [vmem:[#allocation2 + $0x18] sm:$0xff] }
 0x1d4   : > { %v1736_v51 = vadd.f32 %v1708_v19, %v1663_v14  ;;  %v1723_v28 = vadd.f32 %v1695_v7, %v3453_v32  ;;  %1217 = vst.msk [vmem:[#allocation2 + $0x20] sm:$0xff] %vm677_vm1, %v1189_v12  ;;  %v1711_v14 = vld [vmem:[#allocation2 + $0x98] sm:$0xff] }
 0x1d5   : > { %v1791_v4 = vld [vmem:[#allocation2 + $0x78] sm:$0xff] }
 0x1d6   : > { %1764 = vst.msk [vmem:[#allocation2 + $0x80] sm:$0xff] %vm677_vm1, %v1736_v51  ;;  %v1823_v40 = vadd.f32 %v3528_v18, %v1791_v4  ;;  %v1778_v7 = vld [vmem:[#allocation2 + $0x10] sm:$0xff] }
 0x1d7   : > { %1751 = vst.msk [vmem:[#allocation2 + $0x18] sm:$0xff] %vm677_vm1, %v1723_v28  ;;  %v1099_v30 = vpop.f32.mrf.mxu2  ;;  %v1777_v28 = vld [vmem:[#allocation2 + $0x8] sm:$0xff]  ;;  %v1810_v29 = vadd.f32 %v3528_v18, %v1778_v7 }
 0x1d8   : > { %v1851_v36 = vmax.f32 %v1823_v40, 0.0  ;;  %v1100_v32 = vadd.f32 %v1099_v30, %v3332_v25 }
 0x1d9   : > { %v1664_v23 = vpop.f32.mrf.mxu3  ;;  %v1588_v20 = vpop.f32.mrf.mxu1  ;;  %v1838_v35 = vmax.f32 %v1810_v29, 0.0 }
 0x1da   : > { %v1665_v11 = vadd.f32 %v1664_v23, %v1585_v15  ;;  %v1871_v38 = vpack.c.bf16 %v1851_v36, %v1850_v61  ;;  %v1190_v45 = vadd.f32 %v1162_v62, %v1100_v32  ;;  %v1776_v61 = vld [vmem:[#allocation2] sm:$0xff]  ;;  %v1809_v23 = vadd.f32 %v3528_v18, %v1777_v28 }
 0x1db   : > { %v1696_v34 = vld [vmem:[#allocation2 + $0x20] sm:$0xff]  ;;  %v1808_v62 = vadd.f32 %v3528_v18, %v1776_v61 }
 0x1dc   : > { %v1737_v49 = vadd.f32 %v1709_v17, %v1665_v11  ;;  %1931 = vmatpush.bf16.msrb.mxu0 %v1871_v38  ;;  %v1724_v25 = vadd.f32 %v1696_v34, %v3460_v46  ;;  %1218 = vst.msk [vmem:[#allocation2 + $0x28] sm:$0xff] %vm677_vm1, %v1190_v45  ;;  %v1712_v36 = vld [vmem:[#allocation2 + $0xa0] sm:$0xff]  ;;  %v1837_v38 = vmax.f32 %v1809_v23, 0.0 }
 0x1dd   : > { %v1836_v41 = vmax.f32 %v1808_v62, 0.0 }
 0x1de   : > { %1765 = vst.msk [vmem:[#allocation2 + $0x88] sm:$0xff] %vm677_vm1, %v1737_v49  ;;  %v1779_v19 = vld [vmem:[#allocation2 + $0x18] sm:$0xff] }
 0x1df   : > { %1752 = vst.msk [vmem:[#allocation2 + $0x20] sm:$0xff] %vm677_vm1, %v1724_v25  ;;  %v1811_v21 = vadd.f32 %v3528_v18, %v1779_v19  ;;  %v1864_v34 = vpack.c.bf16 %v1837_v38, %v1836_v41  ;;  %v2750_v38 = vld [vmem:[%s3663_s3 + $0x10] sm:$0xf] }
 0x1e0   : > { %1932 = vmatpush.bf16.msrb.mxu0 %v1870_v31 }
 0x1e1   : > { %v1667_v22 = vpop.f32.mrf.mxu3  ;;  %v1590_v33 = vpop.f32.mrf.mxu1  ;;  %v1839_v32 = vmax.f32 %v1811_v21, 0.0 }
 0x1e2   : > { %v1668_v46 = vadd.f32 %v1667_v22, %v1588_v20 }
 0x1e3   : > { %v1697_v47 = vld [vmem:[#allocation2 + $0x28] sm:$0xff]  ;;  %v1865_v11 = vpack.c.bf16 %v1839_v32, %v1838_v35 }
 0x1e4   : > { %v1738_v27 = vadd.f32 %v1710_v2, %v1668_v46  ;;  %1933 = vmatpush.bf16.msrb.mxu0 %v1869_v44  ;;  %v1725_v8 = vadd.f32 %v1697_v47, %v3470_v1  ;;  %v1717_v2 = vld [vmem:[#allocation2 + $0xc8] sm:$0xff] }
 0x1e6   : > { %1766 = vst.msk [vmem:[#allocation2 + $0x90] sm:$0xff] %vm677_vm1, %v1738_v27  ;;  %v1780_v56 = vld [vmem:[#allocation2 + $0x20] sm:$0xff] }
 0x1e7   : > { %1753 = vst.msk [vmem:[#allocation2 + $0x28] sm:$0xff] %vm677_vm1, %v1725_v8  ;;  %v1812_v43 = vadd.f32 %v3528_v18, %v1780_v56  ;;  %v1718_v8 = vld [vmem:[#allocation2 + $0xd0] sm:$0xff]  ;;  %v2924_v56 = vld [vmem:[%s3663_s3 + $0x4] sm:$0xf0] }
 0x1e8   : > { %1934 = vmatpush.bf16.msrb.mxu0 %v1868_v57 }
 0x1e9   : > { %v1669_v24 = vpop.f32.mrf.mxu3  ;;  %v1593_v59 = vpop.f32.mrf.mxu1  ;;  %v1840_v10 = vmax.f32 %v1812_v43, 0.0 }
 0x1ea   : > { %v1670_v15 = vadd.f32 %v1669_v24, %v1590_v33 }
 0x1ec   : > { %v1739_v12 = vadd.f32 %v1711_v14, %v1670_v15  ;;  %1935 = vmatpush.bf16.msrb.mxu0 %v1867_v9  ;;  %v2742_v9 = vld [vmem:[%s3663_s3] sm:$0xf] }
 0x1ed   : > { %v2743_v14 = vor.u32 %v2924_v56, %v2742_v9  ;;  %v2760_v9 = vld [vmem:[%s3663_s3 + $0x28] sm:$0xf0]  ;;  %v2932_v56 = vld [vmem:[%s3664_s4 + $0x18] sm:$0xff] }
 0x1ee   : > { %1767 = vst.msk [vmem:[#allocation2 + $0x98] sm:$0xff] %vm677_vm1, %v1739_v12  ;;  %v1781_v1 = vld [vmem:[#allocation2 + $0x28] sm:$0xff] }
 0x1ef   : > { %v1813_v51 = vadd.f32 %v3528_v18, %v1781_v1 }
 0x1f1   : > { %v1672_v4 = vpop.f32.mrf.mxu3  ;;  %v1841_v40 = vmax.f32 %v1813_v51, 0.0  ;;  %v1595_v26 = vpop.f32.mrf.mxu1 }
 0x1f2   : > { %v1673_v30 = vadd.f32 %v1672_v4, %v1593_v59  ;;  %v1719_v59 = vld [vmem:[#allocation2 + $0xd8] sm:$0xff] }
 0x1f3   : > { %v1866_v5 = vpack.c.bf16 %v1841_v40, %v1840_v10 }
 0x1f4   : > { %v1740_v20 = vadd.f32 %v1712_v36, %v1673_v30 }
 0x1f5   : > { %1936 = vmatpush.bf16.msrb.mxu0 %v1866_v5 }
 0x1f6   : > { %1768 = vst.msk [vmem:[#allocation2 + $0xa0] sm:$0xff] %vm677_vm1, %v1740_v20 }
 0x1f9   : > { %v1674_v39 = vpop.f32.mrf.mxu3  ;;  %1937 = vmatpush.bf16.msrb.mxu0 %v1865_v11  ;;  %v1598_v45 = vpop.f32.mrf.mxu1  ;;  %v1795_v11 = vld [vmem:[#allocation2 + $0x98] sm:$0xff] }
 0x1fa   : > { %v1675_v17 = vadd.f32 %v1674_v39, %v1595_v26  ;;  %v2926_v39 = vld [vmem:[%s3663_s3 + $0x14] sm:$0xf0] }
 0x1fc   : > { %v1741_v49 = vadd.f32 %v1713_v16, %v1675_v17  ;;  %v2751_v17 = vor.u32 %v2926_v39, %v2750_v38  ;;  %v1794_v16 = vld [vmem:[#allocation2 + $0x90] sm:$0xff] }
 0x1fd   : > { %1938 = vmatpush.bf16.msrb.mxu0 %v1864_v34  ;;  %v1796_v23 = vld [vmem:[#allocation2 + $0xa0] sm:$0xff] }
 0x1fe   : > { %1769 = vst.msk [vmem:[#allocation2 + $0xa8] sm:$0xff] %vm677_vm1, %v1741_v49 }
 0x200   : > { %1939 = vmatmul.bf16.vlgmr.msrb.gmra.mxu0 %v2743_v14 }
 0x201   : > { %v1677_v50 = vpop.f32.mrf.mxu3  ;;  %v1600_v53 = vpop.f32.mrf.mxu1 }
 0x202   : > { %v1678_v25 = vadd.f32 %v1677_v50, %v1598_v45  ;;  %v1828_v45 = vadd.f32 %v3528_v18, %v1796_v23  ;;  %v1827_v50 = vadd.f32 %v3528_v18, %v1795_v11 }
 0x204   : > { %v1742_v31 = vadd.f32 %v1714_v52, %v1678_v25  ;;  %v1856_v25 = vmax.f32 %v1828_v45, 0.0  ;;  %v1826_v52 = vadd.f32 %v3528_v18, %v1794_v16 }
 0x205   : > { %v1797_v36 = vld [vmem:[#allocation2 + $0xa8] sm:$0xff] }
 0x206   : > { %1770 = vst.msk [vmem:[#allocation2 + $0xb0] sm:$0xff] %vm677_vm1, %v1742_v31  ;;  %v1829_v62 = vadd.f32 %v3528_v18, %v1797_v36  ;;  %v1792_v31 = vld [vmem:[#allocation2 + $0x80] sm:$0xff] }
 0x208   : > { %v1857_v49 = vmax.f32 %v1829_v62, 0.0 }
 0x209   : > { %v1679_v54 = vpop.f32.mrf.mxu3  ;;  %v1603_v13 = vpop.f32.mrf.mxu1 }
 0x20a   : > { %v1680_v6 = vadd.f32 %v1679_v54, %v1600_v53  ;;  %v1793_v53 = vld [vmem:[#allocation2 + $0x88] sm:$0xff]  ;;  %v1874_v54 = vpack.c.bf16 %v1857_v49, %v1856_v25 }
 0x20c   : > { %v1743_v58 = vadd.f32 %v1715_v55, %v1680_v6  ;;  %v1855_v6 = vmax.f32 %v1827_v50, 0.0  ;;  %v1825_v55 = vadd.f32 %v3528_v18, %v1793_v53 }
 0x20d   : > { %v1798_v26 = vld [vmem:[#allocation2 + $0xb0] sm:$0xff] }
 0x20e   : > { %1771 = vst.msk [vmem:[#allocation2 + $0xb8] sm:$0xff] %vm677_vm1, %v1743_v58  ;;  %v1830_v32 = vadd.f32 %v3528_v18, %v1798_v26  ;;  %v1824_v58 = vadd.f32 %v3528_v18, %v1792_v31 }
 0x210   : > { %v1858_v41 = vmax.f32 %v1830_v32, 0.0  ;;  %1944 = vmatmul.bf16.gmra.mxu0 %v2751_v17 }
 0x211   : > { %v1682_v22 = vpop.f32.mrf.mxu3  ;;  %v1605_v44 = vpop.f32.mrf.mxu1 }
 0x212   : > { %v1683_v33 = vadd.f32 %v1682_v22, %v1603_v13  ;;  %v1854_v13 = vmax.f32 %v1826_v52, 0.0 }
 0x214   : > { %v1744_v46 = vadd.f32 %v1716_v0, %v1683_v33  ;;  %v1873_v22 = vpack.c.bf16 %v1855_v6, %v1854_v13  ;;  %v1853_v33 = vmax.f32 %v1825_v55, 0.0  ;;  %v1852_v0 = vmax.f32 %v1824_v58, 0.0 }
 0x215   : > { %v1799_v28 = vld [vmem:[#allocation2 + $0xb8] sm:$0xff] }
 0x216   : > { %1772 = vst.msk [vmem:[#allocation2 + $0xc0] sm:$0xff] %vm677_vm1, %v1744_v46  ;;  %v1831_v61 = vadd.f32 %v3528_v18, %v1799_v28  ;;  %v2923_v46 = vld [vmem:[%s3663_s3 + $0x4] sm:$0xf] }
 0x218   : > { %v1859_v35 = vmax.f32 %v1831_v61, 0.0 }
 0x219   : > { %v1684_v63 = vpop.f32.mrf.mxu3  ;;  %v1608_v27 = vpop.f32.mrf.mxu1 }
 0x21a   : > { %v1685_v42 = vadd.f32 %v1684_v63, %v1605_v44  ;;  %v1875_v34 = vpack.c.bf16 %v1859_v35, %v1858_v41  ;;  %v2744_v44 = vld [vmem:[%s3663_s3 + $0x8] sm:$0xf0]  ;;  %v1872_v63 = vpack.c.bf16 %v1853_v33, %v1852_v0 }
 0x21c   : > { %v1745_v47 = vadd.f32 %v1717_v2, %v1685_v42  ;;  %v2747_v42 = vor.u32 %v2923_v46, %v2744_v44  ;;  %v2758_v2 = vld [vmem:[%s3663_s3 + $0x20] sm:$0xf]  ;;  %v2104_v44 = vld [vmem:[%s224_s28 + $0x18] sm:$0x1] }
 0x21d   : > { %v1800_v7 = vld [vmem:[#allocation2 + $0xc0] sm:$0xff] }
 0x21e   : > { %1773 = vst.msk [vmem:[#allocation2 + $0xc8] sm:$0xff] %vm677_vm1, %v1745_v47  ;;  %v1832_v40 = vadd.f32 %v3528_v18, %v1800_v7 }
 0x220   : > { %v1860_v5 = vmax.f32 %v1832_v40, 0.0 }
 0x221   : > { %v1687_v37 = vpop.f32.mrf.mxu3  ;;  %v1610_v48 = vpop.f32.mrf.mxu1 }
 0x222   : > { %v1688_v3 = vadd.f32 %v1687_v37, %v1608_v27  ;;  %v2925_v27 = vld [vmem:[%s3663_s3 + $0x14] sm:$0xf]  ;;  %v2752_v37 = vld [vmem:[%s3663_s3 + $0x18] sm:$0xf0] }
 0x224   : > { %v1746_v57 = vadd.f32 %v1718_v8, %v1688_v3  ;;  %v2755_v3 = vor.u32 %v2925_v27, %v2752_v37  ;;  %v1884_v8 = vld [vmem:[%s3663_s3 + $0x30] sm:$0x11] }
 0x225   : > { %v1801_v19 = vld [vmem:[#allocation2 + $0xc8] sm:$0xff] }
 0x226   : > { %1774 = vst.msk [vmem:[#allocation2 + $0xd0] sm:$0xff] %vm677_vm1, %v1746_v57  ;;  %v1833_v21 = vadd.f32 %v3528_v18, %v1801_v19  ;;  %v1904_v57 = vunpack.c.l.b16 %v1884_v8 }
 0x228   : > { %v1861_v30 = vmax.f32 %v1833_v21, 0.0  ;;  %v2929_v21 = vld [vmem:[%s3664_s4] sm:$0xff] }
 0x229   : > { %v1689_v60 = vpop.f32.mrf.mxu3 }
 0x22a   : > { %v1690_v24 = vadd.f32 %v1689_v60, %v1610_v48  ;;  %v1876_v20 = vpack.c.bf16 %v1861_v30, %v1860_v5  ;;  %v2935_v48 = vld [vmem:[%s3664_s4 + $0x30] sm:$0xff]  ;;  %v1912_v60 = vpack.c.b16 %v1904_v57, %v1904_v57 }
 0x22b   : > { %2060 = vmatpush.bf16.msra.mxu0 %v2935_v48 }
 0x22c   : > { %v1747_v15 = vadd.f32 %v1719_v59, %v1690_v24  ;;  %v2934_v24 = vld [vmem:[%s3664_s4 + $0x28] sm:$0xff]  ;;  %v2933_v59 = vld [vmem:[%s3664_s4 + $0x20] sm:$0xff] }
 0x22d   : > { %v1802_v12 = vld [vmem:[#allocation2 + $0xd0] sm:$0xff] }
 0x22e   : > { %1775 = vst.msk [vmem:[#allocation2 + $0xd8] sm:$0xff] %vm677_vm1, %v1747_v15  ;;  %v1834_v43 = vadd.f32 %v3528_v18, %v1802_v12  ;;  %v2927_v15 = vld [vmem:[%s3663_s3 + $0x24] sm:$0xf]  ;;  %v1905_v12 = vunpack.c.h.b16 %v1884_v8 }
 0x22f   : > { %2061 = vmatpush.bf16.msra.mxu0 %v2934_v24  ;;  %v2763_v14 = vor.u32 %v2927_v15, %v2760_v9 }
 0x230   : > { %v1862_v4 = vmax.f32 %v1834_v43, 0.0  ;;  %v1913_v19 = vpack.c.b16 %v1905_v12, %v1905_v12 }
 0x233   : > { %2062 = vmatpush.bf16.msra.mxu0 %v2933_v59 }
 0x235   : > { %v1803_v1 = vld [vmem:[#allocation2 + $0xd8] sm:$0xff] }
 0x236   : > { %v1835_v51 = vadd.f32 %v3528_v18, %v1803_v1  ;;  %v2928_v18 = vld [vmem:[%s3663_s3 + $0x24] sm:$0xf0]  ;;  %v2931_v1 = vld [vmem:[%s3664_s4 + $0x10] sm:$0xff] }
 0x237   : > { %v2759_v47 = vor.u32 %v2928_v18, %v2758_v2  ;;  %2063 = vmatpush.bf16.msra.mxu0 %v2932_v56 }
 0x238   : > { %v1863_v10 = vmax.f32 %v1835_v51, 0.0  ;;  %v2930_v51 = vld [vmem:[%s3664_s4 + $0x8] sm:$0xff] }
 0x239   : > { %1949 = vmatmul.bf16.gmra.mxu0 %v2759_v47 }
 0x23a   : > { %v1877_v29 = vpack.c.bf16 %v1863_v10, %v1862_v4 }
 0x23b   : > { %2064 = vmatpush.bf16.msra.mxu0 %v2931_v1 }
 0x23c   : > { %1961 = vmatpush.bf16.msrb.mxu2 %v1877_v29 }
 0x23f   : > { %2065 = vmatpush.bf16.msra.mxu0 %v2930_v51 }
 0x240   : > { %1962 = vmatpush.bf16.msrb.mxu2 %v1876_v20 }
 0x243   : > { %2066 = vmatpush.bf16.msra.mxu0 %v2929_v21 }
 0x244   : > { %1963 = vmatpush.bf16.msrb.mxu2 %v1875_v34 }
 0x248   : > { %1964 = vmatpush.bf16.msrb.mxu2 %v1874_v54 }
 0x249   : > { %1954 = vmatmul.bf16.gmra.mxu0 %v1912_v60 }
 0x24c   : > { %1965 = vmatpush.bf16.msrb.mxu2 %v1873_v22 }
 0x250   : > { %1966 = vmatpush.bf16.msrb.mxu2 %v1872_v63 }
 0x253   : > { %2764 = vmatmul.msk.bf16.vlgmr.msrb.gmra.mxu2 %vm1918_vm2, %v2747_v42 }
 0x263   : > { %2765 = vmatmul.msk.bf16.gmra.mxu2 %vm1918_vm2, %v2755_v3 }
 0x273   : > { %2766 = vmatmul.msk.bf16.gmra.mxu2 %vm1918_vm2, %v2763_v14 }
 0x27d   : > { %v1940_v43 = vpop.f32.mrf.mxu0 }
 0x283   : > { %2767 = vmatmul.msk.bf16.gmra.mxu2 %vm1918_vm2, %v1913_v19 }
 0x285   : > { %v1942_v7 = vpop.f32.mrf.mxu0 }
 0x28d   : > { %v1945_v28 = vpop.f32.mrf.mxu0 }
 0x295   : > { %v1947_v4 = vpop.f32.mrf.mxu0 }
 0x2b6   : > { %v1950_v10 = vpop.f32.mrf.mxu0 }
 0x2be   : > { %v1952_v26 = vpop.f32.mrf.mxu0 }
 0x2c6   : > { %v1955_v5 = vpop.f32.mrf.mxu0 }
 0x2ce   : > { %v1957_v23 = vpop.f32.mrf.mxu0 }
 0x2d6   : > { %v1968_v40 = vpop.f32.mrf.mxu2 }
 0x2d7   : > { %v1969_v30 = vadd.f32 %v1968_v40, %v1940_v43 }
 0x2de   : > { %v1970_v29 = vpop.f32.mrf.mxu2 }
 0x2df   : > { %v1971_v61 = vadd.f32 %v1970_v29, %v1942_v7 }
 0x2e1   : > { %v1987_v36 = vpack.c.bf16 %v1971_v61, %v1969_v30 }
 0x2e3   : > { %2796 = vmatmul.msk.bf16.vlgmr.msra.gmra.mxu0 %vm677_vm1, %v1987_v36 }
 0x2e6   : > { %v1973_v32 = vpop.f32.mrf.mxu2 }
 0x2e7   : > { %v1974_v35 = vadd.f32 %v1973_v32, %v1945_v28 }
 0x2ee   : > { %v1975_v20 = vpop.f32.mrf.mxu2 }
 0x2ef   : > { %v1976_v62 = vadd.f32 %v1975_v20, %v1947_v4 }
 0x2f1   : > { %v1988_v11 = vpack.c.bf16 %v1976_v62, %v1974_v35 }
 0x2f3   : > { %2797 = vmatmul.msk.bf16.gmra.mxu0 %vm677_vm1, %v1988_v11 }
 0x2f6   : > { %v1978_v38 = vpop.f32.mrf.mxu2 }
 0x2f7   : > { %v1979_v41 = vadd.f32 %v1978_v38, %v1950_v10 }
 0x2fe   : > { %v1980_v39 = vpop.f32.mrf.mxu2 }
 0x2ff   : > { %v1981_v45 = vadd.f32 %v1980_v39, %v1952_v26 }
 0x301   : > { %v1989_v17 = vpack.c.bf16 %v1981_v45, %v1979_v41 }
 0x303   : > { %2798 = vmatmul.msk.bf16.gmra.mxu0 %vm677_vm1, %v1989_v17 }
 0x306   : > { %v1983_v16 = vpop.f32.mrf.mxu2 }
 0x307   : > { %v1984_v34 = vadd.f32 %v1983_v16, %v1955_v5 }
 0x309   : > { %v1990_v50 = vpack.c.bf16 %v1984_v34, %v1984_v34 }
 0x30e   : > { %v1985_v49 = vpop.f32.mrf.mxu2 }
 0x313   : > { %2799 = vmatmul.msk.bf16.gmra.mxu0 %vm677_vm1, %v1990_v50 }
 0x360   : > { %v2068_v53 = vpop.f32.mrf.mxu0 }
 0x361   : > { %v2087_v25 = vpack.c.bf16 %v2068_v53, %v2068_v53 }
 0x363   : > { %2095 = vst.msk [vmem:[%s224_s28] sm:$0xf] %vm2094_vm3, %v2087_v25 }
 0x368   : > { %v2070_v52 = vpop.f32.mrf.mxu0 }
 0x369   : > { %v2088_v31 = vpack.c.bf16 %v2070_v52, %v2070_v52 }
 0x36b   : > { %2096 = vst.msk [vmem:[%s224_s28 + $0x4] sm:$0xf] %vm2094_vm3, %v2088_v31 }
 0x370   : > { %v2073_v54 = vpop.f32.mrf.mxu0 }
 0x371   : > { %v2089_v6 = vpack.c.bf16 %v2073_v54, %v2073_v54 }
 0x373   : > { %2097 = vst.msk [vmem:[%s224_s28 + $0x8] sm:$0xf] %vm2094_vm3, %v2089_v6 }
 0x378   : > { %v2075_v55 = vpop.f32.mrf.mxu0 }
 0x379   : > { %v2090_v13 = vpack.c.bf16 %v2075_v55, %v2075_v55 }
 0x37b   : > { %2098 = vst.msk [vmem:[%s224_s28 + $0xc] sm:$0xf] %vm2094_vm3, %v2090_v13 }
 0x380   : > { %v2078_v58 = vpop.f32.mrf.mxu0 }
 0x381   : > { %v2091_v22 = vpack.c.bf16 %v2078_v58, %v2078_v58 }
 0x383   : > { %2099 = vst.msk [vmem:[%s224_s28 + $0x10] sm:$0xf] %vm2094_vm3, %v2091_v22 }
 0x388   : > { %v2080_v33 = vpop.f32.mrf.mxu0 }
 0x389   : > { %v2092_v0 = vpack.c.bf16 %v2080_v33, %v2080_v33 }
 0x38b   : > { %2100 = vst.msk [vmem:[%s224_s28 + $0x14] sm:$0xf] %vm2094_vm3, %v2092_v0 }
 0x390   : > { %v2083_v46 = vpop.f32.mrf.mxu0 }
 0x391   : > { %v2093_v63 = vpack.c.bf16 %v2083_v46, %v2083_v46 }
 0x393   : > { %v2105_v42 = vsel %vm2103_vm6, %v2093_v63, %v2104_v44 }
 0x394   : > { %2106 = vst [vmem:[%s224_s28 + $0x18] sm:$0x1] %v2105_v42 }
 0x398   : > { %v2085_v2 = vpop.f32.mrf.mxu0 }
 0x399 PF: > { %s15_s18 = sadd.s32 1, %s2960_s18  }
 0x39a   : > { %p12_p4 = scmp.ge.s32.totalorder %s15_s18, 4  }
 0x39c   :  { %14 = sbr.rel (!%p12_p4) target bundleno = 1 (0x1), region = 72 }

</bundles_post_ra>
